<compile_context>
chip_gen: v5e
topology: v5e:2x2
jax: 0.10.0
libtpu: 0.0.40
codegen_flags: <defaults>
</compile_context>

<pallas_src>
import functools

import jax
import jax.numpy as jnp
from jax.experimental import pallas as pl
from jax.experimental.pallas import tpu as pltpu


def _round_up(x, m):
    return (x + m - 1) // m * m


def _pad2d(a, rows, cols):
    return jnp.pad(a, ((0, rows - a.shape[0]), (0, cols - a.shape[1])))


def _choose_tile(n):
    """Largest 128-multiple tile that (a) keeps row-padding overhead modest and
    (b) leaves >= 2 row tiles so both v7x TensorCores get work when possible."""
    n128 = _round_up(max(n, 8), 128)
    budget = int(n128 * 1.25)
    for t in (512, 256, 128):
        n_pad = _round_up(n128, t)
        if n_pad <= budget and n_pad // t >= 2:
            return t
    return 128


def _invariant_spec(shape):
    """BlockSpec for a grid-invariant operand; single-buffered when supported."""
    idx = lambda i, k: (0,) * len(shape)
    if hasattr(pl, "Buffered"):
        try:
            return pl.BlockSpec(shape, idx, pipeline_mode=pl.Buffered(1))
        except TypeError:
            pass
    return pl.BlockSpec(shape, idx)


def _sage_layer_kernel(b_ref, x_src_ref, x_self_ref, inv_deg_ref,
                       wl_ref, wr_ref, bias_ref, out_ref, acc_ref, root_ref,
                       *, apply_relu):
    k = pl.program_id(1)

    @pl.when(k == 0)
    def _():
        acc_ref[...] = jnp.zeros_like(acc_ref)
        # Root/self path + bias computed up front (overlaps with the DMA-dominated
        # early contraction steps) so the last step only holds the agg projection.
        root_ref[...] = (
            jnp.dot(x_self_ref[...].astype(jnp.float32), wr_ref[...],
                    preferred_element_type=jnp.float32)
            + bias_ref[...])

    # Unnormalized neighbor-feature sum: bf16 x bf16 on the MXU, f32 accumulate.
    acc_ref[...] += jnp.dot(b_ref[...], x_src_ref[...],
                            preferred_element_type=jnp.float32)

    @pl.when(k == pl.num_programs(1) - 1)
    def _():
        # Mean aggregation: exact f32 per-row 1/deg scale (0 for isolated nodes).
        agg = acc_ref[...] * inv_deg_ref[...]
        out = jnp.dot(agg, wl_ref[...], preferred_element_type=jnp.float32)
        out = out + root_ref[...]
        if apply_relu:
            out = jnp.maximum(out, 0.0)
        out_ref[...] = out.astype(out_ref.dtype)


def sage_conv_layer(b_mat, inv_deg, x, w_l_t, w_r_t, bias, *,
                    apply_relu, out_dtype, tm, tk):
    """One SAGEConv layer. Operands already padded:
       b_mat [Np,Np] bf16, inv_deg [Np,1] f32, x [Np,Fi] bf16,
       w_l_t / w_r_t [Fi,Fo] f32, bias [1,Fo] f32."""
    n_pad = b_mat.shape[0]
    f_in = x.shape[1]
    f_out = w_l_t.shape[1]
    assert n_pad % tm == 0 and n_pad % tk == 0, (n_pad, tm, tk)
    grid = (n_pad // tm, n_pad // tk)

    kernel = functools.partial(_sage_layer_kernel, apply_relu=apply_relu)

    return pl.pallas_call(
        kernel,
        out_shape=jax.ShapeDtypeStruct((n_pad, f_out), out_dtype),
        grid_spec=pltpu.PrefetchScalarGridSpec(
            num_scalar_prefetch=0,
            grid=grid,
            in_specs=[
                pl.BlockSpec((tm, tk), lambda i, k: (i, k)),      # B tile (bf16)
                pl.BlockSpec((tk, f_in), lambda i, k: (k, 0)),    # X rows (contraction)
                pl.BlockSpec((tm, f_in), lambda i, k: (i, 0)),    # X rows (self/root)
                pl.BlockSpec((tm, 1), lambda i, k: (i, 0)),       # 1 / in-degree
                _invariant_spec((f_in, f_out)),                   # W_l^T (f32)
                _invariant_spec((f_in, f_out)),                   # W_r^T (f32)
                _invariant_spec((1, f_out)),                      # bias
            ],
            out_specs=pl.BlockSpec((tm, f_out), lambda i, k: (i, 0)),
            scratch_shapes=[
                pltpu.VMEM((tm, f_in), jnp.float32),   # f32 aggregation accumulator
                pltpu.VMEM((tm, f_out), jnp.float32),  # root path + bias
            ],
        ),
        compiler_params=pltpu.CompilerParams(
            dimension_semantics=("parallel", "arbitrary"),
        ),
    )(b_mat, x, x, inv_deg, w_l_t, w_r_t, bias)


def build_graph_operands(edge_index, n_pad):
    """B[i, j] = multiplicity of edge j -> i (bf16; exact for counts < 256) and
    exact f32 1/in-degree (0 for isolated nodes).  For a static graph this can be
    computed once and cached across forward calls."""
    src = edge_index[0].astype(jnp.int32)
    dst = edge_index[1].astype(jnp.int32)
    b_mat = jnp.zeros((n_pad, n_pad), jnp.float32).at[dst, src].add(1.0)
    b_mat = b_mat.astype(jnp.bfloat16)
    # O(E) degree scatter instead of an O(N^2) row-sum over the dense matrix.
    deg = jnp.zeros((n_pad, 1), jnp.float32).at[dst].add(1.0)
    inv_deg = jnp.where(deg > 0.0, 1.0 / jnp.maximum(deg, 1.0), 0.0)
    return b_mat, inv_deg


def gnn_forward(x, edge_index, params):
    """2-layer GraphSAGE forward.
       x [N, F_in] f32, edge_index [2, E] int32 (row 0 = src j, row 1 = dst i).
       params: w_l1/w_r1 [H, F_in], b_l1 [H], w_l2/w_r2 [H, H], b_l2 [H]."""
    n, f_in = x.shape
    hidden = params["w_l1"].shape[0]

    tile = _choose_tile(n)
    n_pad = _round_up(max(n, tile), tile)
    fi_pad = _round_up(f_in, 128)
    fo_pad = _round_up(hidden, 128)

    b_mat, inv_deg = build_graph_operands(edge_index, n_pad)

    # Node features streamed to the MXU in bf16 (aggregation counts stay exact;
    # activations pick up ~bf16 rounding).
    x_p = _pad2d(x, n_pad, fi_pad).astype(jnp.bfloat16)

    # Layer 1 (pre-transposed, zero-padded f32 weights; ReLU; bf16 intermediate).
    wl1 = _pad2d(params["w_l1"].T.astype(jnp.float32), fi_pad, fo_pad)
    wr1 = _pad2d(params["w_r1"].T.astype(jnp.float32), fi_pad, fo_pad)
    bl1 = _pad2d(params["b_l1"].astype(jnp.float32)[None, :], 1, fo_pad)
    h1 = sage_conv_layer(b_mat, inv_deg, x_p, wl1, wr1, bl1,
                         apply_relu=True, out_dtype=jnp.bfloat16, tm=tile, tk=tile)
    # No inter-layer masking: padded rows of h1 hold relu(bias) but their B columns
    # are all zero, so they never reach real rows and are sliced off below.

    # Layer 2 (no ReLU, f32 output).
    wl2 = _pad2d(params["w_l2"].T.astype(jnp.float32), fo_pad, fo_pad)
    wr2 = _pad2d(params["w_r2"].T.astype(jnp.float32), fo_pad, fo_pad)
    bl2 = _pad2d(params["b_l2"].astype(jnp.float32)[None, :], 1, fo_pad)
    h2 = sage_conv_layer(b_mat, inv_deg, h1, wl2, wr2, bl2,
                         apply_relu=False, out_dtype=jnp.float32, tm=tile, tk=tile)

    return h2[:n, :hidden]


def gnn_reference(x, edge_index, params):
    """Pure-JAX f32 reference with identical semantics."""
    n = x.shape[0]
    src, dst = edge_index[0], edge_index[1]
    a = jnp.zeros((n, n), jnp.float32).at[dst, src].add(1.0)
    deg = a.sum(axis=1, keepdims=True)
    inv_deg = jnp.where(deg > 0, 1.0 / jnp.maximum(deg, 1.0), 0.0)

    def layer(h, wl, wr, b):
        agg = (a @ h) * inv_deg
        return agg @ wl.T + b + h @ wr.T

    h1 = jax.nn.relu(layer(x, params["w_l1"], params["w_r1"], params["b_l1"]))
    return layer(h1, params["w_l2"], params["w_r2"], params["b_l2"])


if __name__ == "__main__":
    key = jax.random.PRNGKey(0)
    n, f_in, hidden, n_edges = 200, 32, 32, 800

    k_x, k_e1, k_e2, k1, k2, k3, k4, k5, k6 = jax.random.split(key, 9)
    x = jax.random.normal(k_x, (n, f_in), jnp.float32)
    src = jax.random.randint(k_e1, (n_edges,), 0, n, dtype=jnp.int32)
    dst = jax.random.randint(k_e2, (n_edges,), 0, n, dtype=jnp.int32)
    edge_index = jnp.stack([src, dst])

    s1 = 1.0 / float(jnp.sqrt(jnp.float32(f_in)))
    s2 = 1.0 / float(jnp.sqrt(jnp.float32(hidden)))
    params = {
        "w_l1": jax.random.uniform(k1, (hidden, f_in), jnp.float32, -s1, s1),
        "w_r1": jax.random.uniform(k2, (hidden, f_in), jnp.float32, -s1, s1),
        "b_l1": jax.random.uniform(k3, (hidden,), jnp.float32, -s1, s1),
        "w_l2": jax.random.uniform(k4, (hidden, hidden), jnp.float32, -s2, s2),
        "w_r2": jax.random.uniform(k5, (hidden, hidden), jnp.float32, -s2, s2),
        "b_l2": jax.random.uniform(k6, (hidden,), jnp.float32, -s2, s2),
    }

    out = jax.block_until_ready(jax.jit(gnn_forward)(x, edge_index, params))
    ref = jax.block_until_ready(gnn_reference(x, edge_index, params))

    assert out.shape == (n, hidden), out.shape
    # bf16 feature / intermediate streaming (aggregation counts stay exact in f32).
    max_err = float(jnp.max(jnp.abs(out - ref)))
    assert max_err < 5e-2, f"max abs error {max_err}"
    print("KERNEL_OK")
</pallas_src>

<mosaic_0001>
module attributes {stable_mosaic.version = 11 : i64} {
  func.func @_sage_layer_kernel(%arg0: i32, %arg1: i32, %arg2: memref<128x128xbf16, #tpu.memory_space<vmem>>, %arg3: memref<128x128xbf16, #tpu.memory_space<vmem>>, %arg4: memref<128x128xbf16, #tpu.memory_space<vmem>>, %arg5: memref<128x1xf32, #tpu.memory_space<vmem>>, %arg6: memref<128x128xf32, #tpu.memory_space<vmem>>, %arg7: memref<128x128xf32, #tpu.memory_space<vmem>>, %arg8: memref<1x128xf32, #tpu.memory_space<vmem>>, %arg9: memref<128x128xf32, #tpu.memory_space<vmem>>, %arg10: memref<128x128xf32, #tpu.memory_space<vmem>>, %arg11: memref<128x128xf32, #tpu.memory_space<vmem>>) attributes {dimension_semantics = [#tpu.dimension_semantics<parallel>, #tpu.dimension_semantics<arbitrary>], iteration_bounds = array<i64: 2, 2>, scalar_prefetch = 0 : i64, scratch_operands = 2 : i64, tpu.core_type = #tpu.core_type<tc>, window_params = [{transform_indices = @transform_0, window_bounds = array<i64: 128, 128>}, {transform_indices = @transform_1, window_bounds = array<i64: 128, 128>}, {transform_indices = @transform_2, window_bounds = array<i64: 128, 128>}, {transform_indices = @transform_3, window_bounds = array<i64: 128, 1>}, {pipeline_mode = #tpu.pipeline_mode<synchronous>, transform_indices = @transform_4, window_bounds = array<i64: 128, 128>}, {pipeline_mode = #tpu.pipeline_mode<synchronous>, transform_indices = @transform_5, window_bounds = array<i64: 128, 128>}, {pipeline_mode = #tpu.pipeline_mode<synchronous>, transform_indices = @transform_6, window_bounds = array<i64: 1, 128>}, {transform_indices = @transform_7, window_bounds = array<i64: 128, 128>}]} {
    %c0_i32 = arith.constant 0 : i32
    %0 = arith.cmpi eq, %arg1, %c0_i32 : i32
    %1 = arith.extui %0 : i1 to i32
    %c0_i32_0 = arith.constant 0 : i32
    %2 = arith.cmpi ne, %1, %c0_i32_0 : i32
    scf.if %2 {
      %cst_9 = arith.constant 0.000000e+00 : f32
      %12 = vector.broadcast %cst_9 : f32 to vector<128x128xf32>
      %c0_10 = arith.constant 0 : index
      %c0_11 = arith.constant 0 : index
      %13 = vector.load %arg10[%c0_10, %c0_11] : memref<128x128xf32, #tpu.memory_space<vmem>>, vector<128x128xf32>
      tpu.vector_store %arg10[%c0_10, %c0_11], %12 {strides = array<i32>} : memref<128x128xf32, #tpu.memory_space<vmem>>, vector<128x128xf32>,
      %c0_12 = arith.constant 0 : index
      %c0_13 = arith.constant 0 : index
      %14 = vector.load %arg4[%c0_12, %c0_13] : memref<128x128xbf16, #tpu.memory_space<vmem>>, vector<128x128xbf16>
      %15 = arith.extf %14 : vector<128x128xbf16> to vector<128x128xf32>
      %c0_14 = arith.constant 0 : index
      %c0_15 = arith.constant 0 : index
      %16 = vector.load %arg7[%c0_14, %c0_15] : memref<128x128xf32, #tpu.memory_space<vmem>>, vector<128x128xf32>
      %cst_16 = arith.constant dense<0.000000e+00> : vector<128x128xf32>
      %17 = tpu.matmul %15, %16, %cst_16 {dimension_numbers = #tpu.dot_dimension_numbers<[1], [0], [0], [1], [0, 0, 1, 1], [], []>} : vector<128x128xf32>, vector<128x128xf32>, vector<128x128xf32> -> vector<128x128xf32>
      %c0_17 = arith.constant 0 : index
      %c0_18 = arith.constant 0 : index
      %18 = vector.load %arg8[%c0_17, %c0_18] : memref<1x128xf32, #tpu.memory_space<vmem>>, vector<1x128xf32>
      %19 = vector.broadcast %18 : vector<1x128xf32> to vector<128x128xf32>
      %20 = arith.addf %17, %19 : vector<128x128xf32>
      %c0_19 = arith.constant 0 : index
      %c0_20 = arith.constant 0 : index
      %21 = vector.load %arg11[%c0_19, %c0_20] : memref<128x128xf32, #tpu.memory_space<vmem>>, vector<128x128xf32>
      tpu.vector_store %arg11[%c0_19, %c0_20], %20 {strides = array<i32>} : memref<128x128xf32, #tpu.memory_space<vmem>>, vector<128x128xf32>,
    } else {
    }
    %c0 = arith.constant 0 : index
    %c0_1 = arith.constant 0 : index
    %3 = vector.load %arg10[%c0, %c0_1] : memref<128x128xf32, #tpu.memory_space<vmem>>, vector<128x128xf32>
    %c0_2 = arith.constant 0 : index
    %c0_3 = arith.constant 0 : index
    %4 = vector.load %arg2[%c0_2, %c0_3] : memref<128x128xbf16, #tpu.memory_space<vmem>>, vector<128x128xbf16>
    %c0_4 = arith.constant 0 : index
    %c0_5 = arith.constant 0 : index
    %5 = vector.load %arg3[%c0_4, %c0_5] : memref<128x128xbf16, #tpu.memory_space<vmem>>, vector<128x128xbf16>
    %cst = arith.constant dense<0.000000e+00> : vector<128x128xf32>
    %6 = tpu.matmul %4, %5, %cst {dimension_numbers = #tpu.dot_dimension_numbers<[1], [0], [0], [1], [0, 0, 1, 1], [], []>} : vector<128x128xbf16>, vector<128x128xbf16>, vector<128x128xf32> -> vector<128x128xf32>
    %7 = arith.addf %3, %6 : vector<128x128xf32>
    %c0_6 = arith.constant 0 : index
    %c0_7 = arith.constant 0 : index
    %8 = vector.load %arg10[%c0_6, %c0_7] : memref<128x128xf32, #tpu.memory_space<vmem>>, vector<128x128xf32>
    tpu.vector_store %arg10[%c0_6, %c0_7], %7 {strides = array<i32>} : memref<128x128xf32, #tpu.memory_space<vmem>>, vector<128x128xf32>,
    %c1_i32 = arith.constant 1 : i32
    %9 = arith.cmpi eq, %arg1, %c1_i32 : i32
    %10 = arith.extui %9 : i1 to i32
    %c0_i32_8 = arith.constant 0 : i32
    %11 = arith.cmpi ne, %10, %c0_i32_8 : i32
    scf.if %11 {
      %c0_9 = arith.constant 0 : index
      %c0_10 = arith.constant 0 : index
      %12 = vector.load %arg10[%c0_9, %c0_10] : memref<128x128xf32, #tpu.memory_space<vmem>>, vector<128x128xf32>
      %c0_11 = arith.constant 0 : index
      %c0_12 = arith.constant 0 : index
      %13 = vector.load %arg5[%c0_11, %c0_12] : memref<128x1xf32, #tpu.memory_space<vmem>>, vector<128x1xf32>
      %14 = vector.broadcast %13 : vector<128x1xf32> to vector<128x128xf32>
      %15 = arith.mulf %12, %14 : vector<128x128xf32>
      %c0_13 = arith.constant 0 : index
      %c0_14 = arith.constant 0 : index
      %16 = vector.load %arg6[%c0_13, %c0_14] : memref<128x128xf32, #tpu.memory_space<vmem>>, vector<128x128xf32>
      %cst_15 = arith.constant dense<0.000000e+00> : vector<128x128xf32>
      %17 = tpu.matmul %15, %16, %cst_15 {dimension_numbers = #tpu.dot_dimension_numbers<[1], [0], [0], [1], [0, 0, 1, 1], [], []>} : vector<128x128xf32>, vector<128x128xf32>, vector<128x128xf32> -> vector<128x128xf32>
      %c0_16 = arith.constant 0 : index
      %c0_17 = arith.constant 0 : index
      %18 = vector.load %arg11[%c0_16, %c0_17] : memref<128x128xf32, #tpu.memory_space<vmem>>, vector<128x128xf32>
      %19 = arith.addf %17, %18 : vector<128x128xf32>
      %c0_18 = arith.constant 0 : index
      %c0_19 = arith.constant 0 : index
      %20 = vector.load %arg9[%c0_18, %c0_19] : memref<128x128xf32, #tpu.memory_space<vmem>>, vector<128x128xf32>
      tpu.vector_store %arg9[%c0_18, %c0_19], %19 {strides = array<i32>} : memref<128x128xf32, #tpu.memory_space<vmem>>, vector<128x128xf32>,
    } else {
    }
    return
  }
  func.func @transform_0(%arg0: i32, %arg1: i32) -> (i32, i32) {
    %c0_i32 = arith.constant 0 : i32
    return %arg0, %arg1 : i32, i32
  }
  func.func @transform_1(%arg0: i32, %arg1: i32) -> (i32, i32) {
    %c0_i32 = arith.constant 0 : i32
    %c0_i32_0 = arith.constant 0 : i32
    return %arg1, %c0_i32 : i32, i32
  }
  func.func @transform_2(%arg0: i32, %arg1: i32) -> (i32, i32) {
    %c0_i32 = arith.constant 0 : i32
    %c0_i32_0 = arith.constant 0 : i32
    return %arg0, %c0_i32 : i32, i32
  }
  func.func @transform_3(%arg0: i32, %arg1: i32) -> (i32, i32) {
    %c0_i32 = arith.constant 0 : i32
    %c0_i32_0 = arith.constant 0 : i32
    return %arg0, %c0_i32 : i32, i32
  }
  func.func @transform_4(%arg0: i32, %arg1: i32) -> (i32, i32) {
    %c0_i32 = arith.constant 0 : i32
    %c0_i32_0 = arith.constant 0 : i32
    %c0_i32_1 = arith.constant 0 : i32
    return %c0_i32, %c0_i32_0 : i32, i32
  }
  func.func @transform_5(%arg0: i32, %arg1: i32) -> (i32, i32) {
    %c0_i32 = arith.constant 0 : i32
    %c0_i32_0 = arith.constant 0 : i32
    %c0_i32_1 = arith.constant 0 : i32
    return %c0_i32, %c0_i32_0 : i32, i32
  }
  func.func @transform_6(%arg0: i32, %arg1: i32) -> (i32, i32) {
    %c0_i32 = arith.constant 0 : i32
    %c0_i32_0 = arith.constant 0 : i32
    %c0_i32_1 = arith.constant 0 : i32
    return %c0_i32, %c0_i32_0 : i32, i32
  }
  func.func @transform_7(%arg0: i32, %arg1: i32) -> (i32, i32) {
    %c0_i32 = arith.constant 0 : i32
    %c0_i32_0 = arith.constant 0 : i32
    return %arg0, %c0_i32 : i32, i32
  }
}

module attributes {stable_mosaic.version = 11 : i64} {
  func.func @_sage_layer_kernel(%arg0: i32, %arg1: i32, %arg2: memref<128x128xbf16, #tpu.memory_space<vmem>>, %arg3: memref<128x128xbf16, #tpu.memory_space<vmem>>, %arg4: memref<128x128xbf16, #tpu.memory_space<vmem>>, %arg5: memref<128x1xf32, #tpu.memory_space<vmem>>, %arg6: memref<128x128xf32, #tpu.memory_space<vmem>>, %arg7: memref<128x128xf32, #tpu.memory_space<vmem>>, %arg8: memref<1x128xf32, #tpu.memory_space<vmem>>, %arg9: memref<128x128xbf16, #tpu.memory_space<vmem>>, %arg10: memref<128x128xf32, #tpu.memory_space<vmem>>, %arg11: memref<128x128xf32, #tpu.memory_space<vmem>>) attributes {dimension_semantics = [#tpu.dimension_semantics<parallel>, #tpu.dimension_semantics<arbitrary>], iteration_bounds = array<i64: 2, 2>, scalar_prefetch = 0 : i64, scratch_operands = 2 : i64, tpu.core_type = #tpu.core_type<tc>, window_params = [{transform_indices = @transform_0, window_bounds = array<i64: 128, 128>}, {transform_indices = @transform_1, window_bounds = array<i64: 128, 128>}, {transform_indices = @transform_2, window_bounds = array<i64: 128, 128>}, {transform_indices = @transform_3, window_bounds = array<i64: 128, 1>}, {pipeline_mode = #tpu.pipeline_mode<synchronous>, transform_indices = @transform_4, window_bounds = array<i64: 128, 128>}, {pipeline_mode = #tpu.pipeline_mode<synchronous>, transform_indices = @transform_5, window_bounds = array<i64: 128, 128>}, {pipeline_mode = #tpu.pipeline_mode<synchronous>, transform_indices = @transform_6, window_bounds = array<i64: 1, 128>}, {transform_indices = @transform_7, window_bounds = array<i64: 128, 128>}]} {
    %c0_i32 = arith.constant 0 : i32
    %0 = arith.cmpi eq, %arg1, %c0_i32 : i32
    %1 = arith.extui %0 : i1 to i32
    %c0_i32_0 = arith.constant 0 : i32
    %2 = arith.cmpi ne, %1, %c0_i32_0 : i32
    scf.if %2 {
      %cst_9 = arith.constant 0.000000e+00 : f32
      %12 = vector.broadcast %cst_9 : f32 to vector<128x128xf32>
      %c0_10 = arith.constant 0 : index
      %c0_11 = arith.constant 0 : index
      %13 = vector.load %arg10[%c0_10, %c0_11] : memref<128x128xf32, #tpu.memory_space<vmem>>, vector<128x128xf32>
      tpu.vector_store %arg10[%c0_10, %c0_11], %12 {strides = array<i32>} : memref<128x128xf32, #tpu.memory_space<vmem>>, vector<128x128xf32>,
      %c0_12 = arith.constant 0 : index
      %c0_13 = arith.constant 0 : index
      %14 = vector.load %arg4[%c0_12, %c0_13] : memref<128x128xbf16, #tpu.memory_space<vmem>>, vector<128x128xbf16>
      %15 = arith.extf %14 : vector<128x128xbf16> to vector<128x128xf32>
      %c0_14 = arith.constant 0 : index
      %c0_15 = arith.constant 0 : index
      %16 = vector.load %arg7[%c0_14, %c0_15] : memref<128x128xf32, #tpu.memory_space<vmem>>, vector<128x128xf32>
      %cst_16 = arith.constant dense<0.000000e+00> : vector<128x128xf32>
      %17 = tpu.matmul %15, %16, %cst_16 {dimension_numbers = #tpu.dot_dimension_numbers<[1], [0], [0], [1], [0, 0, 1, 1], [], []>} : vector<128x128xf32>, vector<128x128xf32>, vector<128x128xf32> -> vector<128x128xf32>
      %c0_17 = arith.constant 0 : index
      %c0_18 = arith.constant 0 : index
      %18 = vector.load %arg8[%c0_17, %c0_18] : memref<1x128xf32, #tpu.memory_space<vmem>>, vector<1x128xf32>
      %19 = vector.broadcast %18 : vector<1x128xf32> to vector<128x128xf32>
      %20 = arith.addf %17, %19 : vector<128x128xf32>
      %c0_19 = arith.constant 0 : index
      %c0_20 = arith.constant 0 : index
      %21 = vector.load %arg11[%c0_19, %c0_20] : memref<128x128xf32, #tpu.memory_space<vmem>>, vector<128x128xf32>
      tpu.vector_store %arg11[%c0_19, %c0_20], %20 {strides = array<i32>} : memref<128x128xf32, #tpu.memory_space<vmem>>, vector<128x128xf32>,
    } else {
    }
    %c0 = arith.constant 0 : index
    %c0_1 = arith.constant 0 : index
    %3 = vector.load %arg10[%c0, %c0_1] : memref<128x128xf32, #tpu.memory_space<vmem>>, vector<128x128xf32>
    %c0_2 = arith.constant 0 : index
    %c0_3 = arith.constant 0 : index
    %4 = vector.load %arg2[%c0_2, %c0_3] : memref<128x128xbf16, #tpu.memory_space<vmem>>, vector<128x128xbf16>
    %c0_4 = arith.constant 0 : index
    %c0_5 = arith.constant 0 : index
    %5 = vector.load %arg3[%c0_4, %c0_5] : memref<128x128xbf16, #tpu.memory_space<vmem>>, vector<128x128xbf16>
    %cst = arith.constant dense<0.000000e+00> : vector<128x128xf32>
    %6 = tpu.matmul %4, %5, %cst {dimension_numbers = #tpu.dot_dimension_numbers<[1], [0], [0], [1], [0, 0, 1, 1], [], []>} : vector<128x128xbf16>, vector<128x128xbf16>, vector<128x128xf32> -> vector<128x128xf32>
    %7 = arith.addf %3, %6 : vector<128x128xf32>
    %c0_6 = arith.constant 0 : index
    %c0_7 = arith.constant 0 : index
    %8 = vector.load %arg10[%c0_6, %c0_7] : memref<128x128xf32, #tpu.memory_space<vmem>>, vector<128x128xf32>
    tpu.vector_store %arg10[%c0_6, %c0_7], %7 {strides = array<i32>} : memref<128x128xf32, #tpu.memory_space<vmem>>, vector<128x128xf32>,
    %c1_i32 = arith.constant 1 : i32
    %9 = arith.cmpi eq, %arg1, %c1_i32 : i32
    %10 = arith.extui %9 : i1 to i32
    %c0_i32_8 = arith.constant 0 : i32
    %11 = arith.cmpi ne, %10, %c0_i32_8 : i32
    scf.if %11 {
      %c0_9 = arith.constant 0 : index
      %c0_10 = arith.constant 0 : index
      %12 = vector.load %arg10[%c0_9, %c0_10] : memref<128x128xf32, #tpu.memory_space<vmem>>, vector<128x128xf32>
      %c0_11 = arith.constant 0 : index
      %c0_12 = arith.constant 0 : index
      %13 = vector.load %arg5[%c0_11, %c0_12] : memref<128x1xf32, #tpu.memory_space<vmem>>, vector<128x1xf32>
      %14 = vector.broadcast %13 : vector<128x1xf32> to vector<128x128xf32>
      %15 = arith.mulf %12, %14 : vector<128x128xf32>
      %c0_13 = arith.constant 0 : index
      %c0_14 = arith.constant 0 : index
      %16 = vector.load %arg6[%c0_13, %c0_14] : memref<128x128xf32, #tpu.memory_space<vmem>>, vector<128x128xf32>
      %cst_15 = arith.constant dense<0.000000e+00> : vector<128x128xf32>
      %17 = tpu.matmul %15, %16, %cst_15 {dimension_numbers = #tpu.dot_dimension_numbers<[1], [0], [0], [1], [0, 0, 1, 1], [], []>} : vector<128x128xf32>, vector<128x128xf32>, vector<128x128xf32> -> vector<128x128xf32>
      %c0_16 = arith.constant 0 : index
      %c0_17 = arith.constant 0 : index
      %18 = vector.load %arg11[%c0_16, %c0_17] : memref<128x128xf32, #tpu.memory_space<vmem>>, vector<128x128xf32>
      %19 = arith.addf %17, %18 : vector<128x128xf32>
      %cst_18 = arith.constant 0.000000e+00 : f32
      %20 = vector.broadcast %cst_18 : f32 to vector<128x128xf32>
      %21 = arith.maximumf %19, %20 : vector<128x128xf32>
      %22 = arith.truncf %21 : vector<128x128xf32> to vector<128x128xbf16>
      %c0_19 = arith.constant 0 : index
      %c0_20 = arith.constant 0 : index
      %23 = vector.load %arg9[%c0_19, %c0_20] : memref<128x128xbf16, #tpu.memory_space<vmem>>, vector<128x128xbf16>
      tpu.vector_store %arg9[%c0_19, %c0_20], %22 {strides = array<i32>} : memref<128x128xbf16, #tpu.memory_space<vmem>>, vector<128x128xbf16>,
    } else {
    }
    return
  }
  func.func @transform_0(%arg0: i32, %arg1: i32) -> (i32, i32) {
    %c0_i32 = arith.constant 0 : i32
    return %arg0, %arg1 : i32, i32
  }
  func.func @transform_1(%arg0: i32, %arg1: i32) -> (i32, i32) {
    %c0_i32 = arith.constant 0 : i32
    %c0_i32_0 = arith.constant 0 : i32
    return %arg1, %c0_i32 : i32, i32
  }
  func.func @transform_2(%arg0: i32, %arg1: i32) -> (i32, i32) {
    %c0_i32 = arith.constant 0 : i32
    %c0_i32_0 = arith.constant 0 : i32
    return %arg0, %c0_i32 : i32, i32
  }
  func.func @transform_3(%arg0: i32, %arg1: i32) -> (i32, i32) {
    %c0_i32 = arith.constant 0 : i32
    %c0_i32_0 = arith.constant 0 : i32
    return %arg0, %c0_i32 : i32, i32
  }
  func.func @transform_4(%arg0: i32, %arg1: i32) -> (i32, i32) {
    %c0_i32 = arith.constant 0 : i32
    %c0_i32_0 = arith.constant 0 : i32
    %c0_i32_1 = arith.constant 0 : i32
    return %c0_i32, %c0_i32_0 : i32, i32
  }
  func.func @transform_5(%arg0: i32, %arg1: i32) -> (i32, i32) {
    %c0_i32 = arith.constant 0 : i32
    %c0_i32_0 = arith.constant 0 : i32
    %c0_i32_1 = arith.constant 0 : i32
    return %c0_i32, %c0_i32_0 : i32, i32
  }
  func.func @transform_6(%arg0: i32, %arg1: i32) -> (i32, i32) {
    %c0_i32 = arith.constant 0 : i32
    %c0_i32_0 = arith.constant 0 : i32
    %c0_i32_1 = arith.constant 0 : i32
    return %c0_i32, %c0_i32_0 : i32, i32
  }
  func.func @transform_7(%arg0: i32, %arg1: i32) -> (i32, i32) {
    %c0_i32 = arith.constant 0 : i32
    %c0_i32_0 = arith.constant 0 : i32
    return %arg0, %c0_i32 : i32, i32
  }
}

</mosaic_0001>

<bundles_post_ra>
// kernel: gnn_forward.3
= control target key start
LH: loop header
LB: loop body
LE: loop exit
PB: predicated region body
PF: predicated region fallthrough
CT: control target
= control target key end

     0   :  { %s1907_s0 = inlined_call_operand.vmem [shape: bf16[256,256], index: 0, kind: input, shape index: {}]   ;;  %s1908_s1 = inlined_call_operand.vmem [shape: bf16[256,128], index: 1, kind: input, shape index: {}, may-alias: {1,2}]   ;;  %s1909_s2 = inlined_call_operand.vmem [shape: bf16[256,128], index: 2, kind: input, shape index: {}, may-alias: {1,2}]   ;;  %s1910_s3 = inlined_call_operand.vmem [shape: f32[256,1], index: 3, kind: input, shape index: {}]   ;;  %s1911_s4 = inlined_call_operand.vmem [shape: f32[128,128], index: 4, kind: input, shape index: {}]   ;;  %s1912_s5 = inlined_call_operand.vmem [shape: f32[128,128], index: 5, kind: input, shape index: {}]   ;;  %s1913_s6 = inlined_call_operand.vmem [shape: f32[1,128], index: 6, kind: input, shape index: {}]   ;;  %s1914_s7 = inlined_call_operand.vmem [shape: f32[256,128], index: 7, kind: output, shape index: {}]  }
   0x1   :  { %1916 = sst [smem:[#allocation6_spill]] %s1907_s0 }
   0x2   :  { %s1624_s24 = smov 0   ;;  %s1626_s25 = smov 0  }
   0x3   :  { %s1628_s26 = smov 0   ;;  %s1630_s27 = smov 0  }
   0x4   :  { %s1632_s28 = smov 0   ;;  %s1634_s29 = smov 0  }
   0x5   :  { %s1636_s30 = smov 0  }
   0x6 LB: > { %s26_s8 = sadd.s32 1, %s1572_s28  ;;  %s29_s9 = sadd.s32 1, %s1576_s29  ;;  %s1580_s30 = sphi %s1636_s30, %s17_s30   ;;  %s1576_s29 = sphi %s1634_s29, %s1925_s29   ;;  %s1572_s28 = sphi %s1632_s28, %s1924_s28   ;;  %s1568_s27 = sphi %s1630_s27, %s1923_s27   ;;  %s1564_s26 = sphi %s1628_s26, %s1922_s26   ;;  %s1560_s25 = sphi %s1626_s25, %s1921_s25   ;;  %s1556_s24 = sphi %s1624_s24, %s1920_s24  }
   0x7   : > { %p27_p0 = scmp.ge.s32.totalorder %s26_s8, 2  ;;  %p45_p1 = scmp.ne.s32.totalorder %s1560_s25, %s1556_s24 }
   0x8   : > { %p46_p2 = scmp.eq.s32.totalorder %s1580_s30, 0  ;;  %s38_s13 = sadd.s32 1, %s1560_s25 }
   0x9   : > { %s1927_s8 = smov (%p27_p0, %s26_s8), 0  ;;  %s1929_s9 = smov (!%p27_p0, %s29_s9), %s1576_s29 }
   0xa   : > { %p47_p3 = por %p46_p2, %p45_p1  ;;  %p31_p4 = scmp.ge.s32.totalorder %s1929_s9, 2 }
   0xb   : > { %s34_s10 = ssub.s32 %s1572_s28, %s1927_s8  ;;  %p1205_p6 = scmp.ge.s32.totalorder %s1580_s30, 4 }
   0xc   : > { %s1931_s9 = smov (%p31_p4, %s1929_s9), 0 }
   0xd   : > { %1917 = sst [smem:[#allocation5_spill]] %s1931_s9  ;;  %s33_s11 = ssub.s32 %s1576_s29, %s1931_s9 }
   0xe   : > { %s35_s12 = sor.u32 %s34_s10, %s33_s11  ;;  %247 = sbr.rel (%p1205_p6) target bundleno = 45 (0x2d), region = 28 }
   0xf   : > { %p36_p5 = scmp.eq.s32.totalorder %s35_s12, 0 }
  0x11   : > { %s1675_s14 = scalar_select %p36_p5, %s1560_s25, %s38_s13  }
  0x13   : > { %250 = sbr.rel (!%p47_p3) target bundleno = 45 (0x2d), region = 32  ;;  %s252_s15 = sand.u32 (%p47_p3), 1, %s1560_s25  }
  0x14   : > { %s1288_s16 = sshll.u32 (%p47_p3), %s1576_s29, 5  ;;  %s1206_s17 = sshll.u32 (%p47_p3), %s252_s15, 6 }
  0x15   : > { %s257_s18 = sadd.s32 (%p47_p3), %s1572_s28, %s1288_s16  ;;  %s1918_s0 = sld [smem:[#allocation6_spill]] (%p47_p3) }
  0x16   : > { %s1209_s19 = sshll.u32 (%p47_p3), %s257_s18, 2  ;;  %s254_s23 = scalar_lea.vmem (%p47_p3), [#allocation4], %s1206_s17 }
  0x1b   : > { %s1684_s22 = scalar_lea.vmem %s1918_s0, %s1209_s19 }
  0x1c   : > { %v276_v0 = vld [vmem:[%s1684_s22] sm:$0xf]  ;;  %v278_v1 = vld [vmem:[%s1684_s22 + $0x8] sm:$0xf]  ;;  %v280_v2 = vld [vmem:[%s1684_s22 + $0x10] sm:$0xf] }
  0x1d   : > { %277 = vst [vmem:[%s254_s23] sm:$0xf] %v276_v0  ;;  %v282_v3 = vld [vmem:[%s1684_s22 + $0x18] sm:$0xf]  ;;  %v284_v4 = vld [vmem:[%s1684_s22 + $0x20] sm:$0xf] }
  0x1e   : > { %279 = vst [vmem:[%s254_s23 + $0x4] sm:$0xf] %v278_v1  ;;  %v286_v5 = vld [vmem:[%s1684_s22 + $0x28] sm:$0xf]  ;;  %v288_v6 = vld [vmem:[%s1684_s22 + $0x30] sm:$0xf] }
  0x1f   : > { %281 = vst [vmem:[%s254_s23 + $0x8] sm:$0xf] %v280_v2  ;;  %v290_v7 = vld [vmem:[%s1684_s22 + $0x38] sm:$0xf]  ;;  %v292_v8 = vld [vmem:[%s1684_s22 + $0x40] sm:$0xf] }
  0x20   : > { %283 = vst [vmem:[%s254_s23 + $0xc] sm:$0xf] %v282_v3  ;;  %v294_v9 = vld [vmem:[%s1684_s22 + $0x48] sm:$0xf]  ;;  %v296_v10 = vld [vmem:[%s1684_s22 + $0x50] sm:$0xf] }
  0x21   : > { %285 = vst [vmem:[%s254_s23 + $0x10] sm:$0xf] %v284_v4  ;;  %v298_v11 = vld [vmem:[%s1684_s22 + $0x58] sm:$0xf]  ;;  %v300_v12 = vld [vmem:[%s1684_s22 + $0x60] sm:$0xf] }
  0x22   : > { %287 = vst [vmem:[%s254_s23 + $0x14] sm:$0xf] %v286_v5  ;;  %v302_v13 = vld [vmem:[%s1684_s22 + $0x68] sm:$0xf]  ;;  %v304_v14 = vld [vmem:[%s1684_s22 + $0x70] sm:$0xf] }
  0x23   : > { %289 = vst [vmem:[%s254_s23 + $0x18] sm:$0xf] %v288_v6  ;;  %v306_v15 = vld [vmem:[%s1684_s22 + $0x78] sm:$0xf] }
  0x24   : > { %291 = vst [vmem:[%s254_s23 + $0x1c] sm:$0xf] %v290_v7 }
  0x25   : > { %293 = vst [vmem:[%s254_s23 + $0x20] sm:$0xf] %v292_v8 }
  0x26   : > { %295 = vst [vmem:[%s254_s23 + $0x24] sm:$0xf] %v294_v9 }
  0x27   : > { %297 = vst [vmem:[%s254_s23 + $0x28] sm:$0xf] %v296_v10 }
  0x28   : > { %299 = vst [vmem:[%s254_s23 + $0x2c] sm:$0xf] %v298_v11 }
  0x29   : > { %301 = vst [vmem:[%s254_s23 + $0x30] sm:$0xf] %v300_v12 }
  0x2a   : > { %303 = vst [vmem:[%s254_s23 + $0x34] sm:$0xf] %v302_v13 }
  0x2b   : > { %305 = vst [vmem:[%s254_s23 + $0x38] sm:$0xf] %v304_v14 }
  0x2c   : > { %307 = vst [vmem:[%s254_s23 + $0x3c] sm:$0xf] %v306_v15 }
  0x2d PF: > { %p1210_p7 = scmp.ge.s32.totalorder %s1580_s30, 1  ;;  %p389_p8 = scmp.lt.s32.totalorder %s1580_s30, 5 }
  0x2f   : > { %p390_p9 = pnand %p1210_p7, %p389_p8 }
  0x30   : > { %s396_s10 = sand.u32 (!%p390_p9), 1, %s1556_s24   ;;  %s1212_s11 = sshll.u32 (!%p390_p9), %s1564_s26, 4 }
  0x31   : > { %393 = sbr.rel (%p390_p9) target bundleno = 738 (0x2e2), region = 85  ;;  %s1211_s12 = sshll.u32 (!%p390_p9), %s396_s10, 6 }
  0x32   : > { %p444_p10 = scmp.lt.s32.totalorder (!%p390_p9), %s1212_s11, 31  ;;  %s1214_s13 = sshll.u32 (!%p390_p9), %s1568_s27, 4 }
  0x33   : > { %p450_p11 = scmp.lt.s32.totalorder (!%p390_p9), %s1214_s13, 31  ;;  %p1220_p12 = scmp.ne.s32.totalorder (!%p390_p9), %s1564_s26, 0 }
  0x36   : > { %s1933_s11 = smov (!%p444_p10, %s1212_s11), 31  ;;  %s1935_s13 = smov (!%p450_p11, %s1214_s13), 31 }
  0x37   : > { %s1213_s15 = sshll.u32 %s1933_s11, 2  ;;  %s1215_s19 = sshll.u32 %s1935_s13, 2 }
  0x38   : > { %s1710_s18 = scalar_lea.vmem %s1908_s1, %s1213_s15  ;;  %s1217_s20 = sshll.u32 %s1935_s13, 3 }
  0x39   : > { %s1715_s23 = scalar_lea.vmem %s1909_s2, %s1215_s19  ;;  %s1720_s27 = scalar_lea.vmem %s1910_s3, %s1217_s20 }
  0x3a   : > { %s1725_s9 = scalar_lea.vmem %s1914_s7, %s1217_s20  ;;  %s1727_s15 = scalar_lea.vmem [#allocation4], %s1211_s12 }
  0x3b   : > { %470 = sbr.rel (%p1220_p12) target bundleno = 256 (0x100), region = 93 }
  0x40   : > { %v534_v16 = vld [vmem:[%s1912_s5 + $0x78] sm:$0xff]  ;;  %v533_v17 = vld [vmem:[%s1912_s5 + $0x70] sm:$0xff]  ;;  %v1582_v18 = vmov 0.0   ;;  %v532_v19 = vld [vmem:[%s1912_s5 + $0x68] sm:$0xff] }
  0x41   : > { %1345 = vmatpush.msra.mxu2 %v534_v16  ;;  %1346 = vmatpush.msra.mxu3 %v534_v16  ;;  %471 = vst [vmem:[#allocation2 + $0x30] sm:$0xff] %v1582_v18  ;;  %v531_v20 = vld [vmem:[%s1912_s5 + $0x60] sm:$0xff]  ;;  %v530_v21 = vld [vmem:[%s1912_s5 + $0x58] sm:$0xff]  ;;  %v529_v22 = vld [vmem:[%s1912_s5 + $0x50] sm:$0xff] }
  0x42   : > { %472 = vst [vmem:[#allocation2] sm:$0xff] %v1582_v18  ;;  %539 = vmatpush.msra.mxu0 %v534_v16  ;;  %1344 = vmatpush.msra.mxu1 %v534_v16  ;;  %v528_v23 = vld [vmem:[%s1912_s5 + $0x48] sm:$0xff]  ;;  %v527_v24 = vld [vmem:[%s1912_s5 + $0x40] sm:$0xff]  ;;  %v526_v25 = vld [vmem:[%s1912_s5 + $0x38] sm:$0xff] }
  0x43   : > { %1348 = vmatpush.msra.mxu2 %v533_v17  ;;  %1349 = vmatpush.msra.mxu3 %v533_v17  ;;  %473 = vst [vmem:[#allocation2 + $0x58] sm:$0xff] %v1582_v18  ;;  %v525_v26 = vld [vmem:[%s1912_s5 + $0x30] sm:$0xff]  ;;  %v524_v27 = vld [vmem:[%s1912_s5 + $0x28] sm:$0xff]  ;;  %v523_v28 = vld [vmem:[%s1912_s5 + $0x20] sm:$0xff] }
  0x44   : > { %474 = vst [vmem:[#allocation2 + $0x18] sm:$0xff] %v1582_v18  ;;  %540 = vmatpush.msra.mxu0 %v533_v17  ;;  %1347 = vmatpush.msra.mxu1 %v533_v17  ;;  %v522_v29 = vld [vmem:[%s1912_s5 + $0x18] sm:$0xff]  ;;  %v521_v30 = vld [vmem:[%s1912_s5 + $0x10] sm:$0xff]  ;;  %v1340_v31 = vld [vmem:[%s1715_s23 + $0x20] sm:$0xff]  }
  0x45   : > { %1351 = vmatpush.msra.mxu2 %v532_v19  ;;  %1352 = vmatpush.msra.mxu3 %v532_v19  ;;  %475 = vst [vmem:[#allocation2 + $0x50] sm:$0xff] %v1582_v18  ;;  %v1342_v32 = vld [vmem:[%s1715_s23 + $0x30] sm:$0xff]   ;;  %v520_v33 = vld [vmem:[%s1912_s5 + $0x8] sm:$0xff]  ;;  %v1306_v34 = vld [vmem:[%s1715_s23] sm:$0xff]   ;;  %v1323_v37 = vunpack.c.l.bf16 %v1340_v31  ;;  %v1324_v41 = vunpack.c.h.bf16 %v1340_v31 }
  0x46   : > { %476 = vst [vmem:[#allocation2 + $0x68] sm:$0xff] %v1582_v18  ;;  %541 = vmatpush.msra.mxu0 %v532_v19  ;;  %1350 = vmatpush.msra.mxu1 %v532_v19  ;;  %v1338_v35 = vld [vmem:[%s1715_s23 + $0x10] sm:$0xff]   ;;  %v519_v36 = vld [vmem:[%s1912_s5] sm:$0xff]  ;;  %v1331_v38 = vunpack.c.l.bf16 %v1342_v32  ;;  %v1307_v39 = vunpack.c.l.bf16 %v1306_v34  ;;  %v1332_v42 = vunpack.c.h.bf16 %v1342_v32  ;;  %v1308_v43 = vunpack.c.h.bf16 %v1306_v34  ;;  %v1341_v45 = vld [vmem:[%s1715_s23 + $0x28] sm:$0xff]  }
  0x47   : > { %477 = vst [vmem:[#allocation2 + $0x8] sm:$0xff] %v1582_v18  ;;  %1354 = vmatpush.msra.mxu2 %v531_v20  ;;  %1355 = vmatpush.msra.mxu3 %v531_v20  ;;  %v1315_v40 = vunpack.c.l.bf16 %v1338_v35  ;;  %v1316_v44 = vunpack.c.h.bf16 %v1338_v35  ;;  %v1343_v46 = vld [vmem:[%s1715_s23 + $0x38] sm:$0xff]   ;;  %v1337_v47 = vld [vmem:[%s1715_s23 + $0x8] sm:$0xff]   ;;  %v1327_v49 = vunpack.c.l.bf16 %v1341_v45  ;;  %v1328_v53 = vunpack.c.h.bf16 %v1341_v45  ;;  %v1522_v57 = vld [vmem:[%s1913_s6] ss:$0 sm:$0xff] }
  0x48   : > { %478 = vst [vmem:[#allocation2 + $0x48] sm:$0xff] %v1582_v18  ;;  %542 = vmatpush.msra.mxu0 %v531_v20  ;;  %1353 = vmatpush.msra.mxu1 %v531_v20  ;;  %v1339_v48 = vld [vmem:[%s1715_s23 + $0x18] sm:$0xff]   ;;  %v1335_v50 = vunpack.c.l.bf16 %v1343_v46  ;;  %v1311_v51 = vunpack.c.l.bf16 %v1337_v47  ;;  %v1336_v54 = vunpack.c.h.bf16 %v1343_v46  ;;  %v1312_v55 = vunpack.c.h.bf16 %v1337_v47 }
  0x49   : > { %479 = vst [vmem:[#allocation2 + $0x40] sm:$0xff] %v1582_v18  ;;  %1357 = vmatpush.msra.mxu2 %v530_v21  ;;  %1358 = vmatpush.msra.mxu3 %v530_v21  ;;  %v1319_v52 = vunpack.c.l.bf16 %v1339_v48  ;;  %v1320_v56 = vunpack.c.h.bf16 %v1339_v48 }
  0x4a   : > { %480 = vst [vmem:[#allocation2 + $0x20] sm:$0xff] %v1582_v18  ;;  %543 = vmatpush.msra.mxu0 %v530_v21  ;;  %1356 = vmatpush.msra.mxu1 %v530_v21 }
  0x4b   : > { %481 = vst [vmem:[#allocation2 + $0x10] sm:$0xff] %v1582_v18  ;;  %1360 = vmatpush.msra.mxu2 %v529_v22  ;;  %1361 = vmatpush.msra.mxu3 %v529_v22 }
  0x4c   : > { %482 = vst [vmem:[#allocation2 + $0x38] sm:$0xff] %v1582_v18  ;;  %544 = vmatpush.msra.mxu0 %v529_v22  ;;  %1359 = vmatpush.msra.mxu1 %v529_v22 }
  0x4d   : > { %483 = vst [vmem:[#allocation2 + $0x60] sm:$0xff] %v1582_v18  ;;  %1363 = vmatpush.msra.mxu2 %v528_v23  ;;  %1364 = vmatpush.msra.mxu3 %v528_v23 }
  0x4e   : > { %484 = vst [vmem:[#allocation2 + $0x70] sm:$0xff] %v1582_v18  ;;  %545 = vmatpush.msra.mxu0 %v528_v23  ;;  %1362 = vmatpush.msra.mxu1 %v528_v23 }
  0x4f   : > { %485 = vst [vmem:[#allocation2 + $0x78] sm:$0xff] %v1582_v18  ;;  %1366 = vmatpush.msra.mxu2 %v527_v24  ;;  %1367 = vmatpush.msra.mxu3 %v527_v24 }
  0x50   : > { %486 = vst [vmem:[#allocation2 + $0x28] sm:$0xff] %v1582_v18  ;;  %546 = vmatpush.msra.mxu0 %v527_v24  ;;  %1365 = vmatpush.msra.mxu1 %v527_v24 }
  0x51   : > { %1369 = vmatpush.msra.mxu2 %v526_v25  ;;  %1370 = vmatpush.msra.mxu3 %v526_v25 }
  0x52   : > { %547 = vmatpush.msra.mxu0 %v526_v25  ;;  %1368 = vmatpush.msra.mxu1 %v526_v25 }
  0x53   : > { %1372 = vmatpush.msra.mxu2 %v525_v26  ;;  %1373 = vmatpush.msra.mxu3 %v525_v26 }
  0x54   : > { %548 = vmatpush.msra.mxu0 %v525_v26  ;;  %1371 = vmatpush.msra.mxu1 %v525_v26 }
  0x55   : > { %1375 = vmatpush.msra.mxu2 %v524_v27  ;;  %1376 = vmatpush.msra.mxu3 %v524_v27 }
  0x56   : > { %549 = vmatpush.msra.mxu0 %v524_v27  ;;  %1374 = vmatpush.msra.mxu1 %v524_v27 }
  0x57   : > { %1378 = vmatpush.msra.mxu2 %v523_v28  ;;  %1379 = vmatpush.msra.mxu3 %v523_v28 }
  0x58   : > { %550 = vmatpush.msra.mxu0 %v523_v28  ;;  %1377 = vmatpush.msra.mxu1 %v523_v28 }
  0x59   : > { %1381 = vmatpush.msra.mxu2 %v522_v29  ;;  %1382 = vmatpush.msra.mxu3 %v522_v29 }
  0x5a   : > { %551 = vmatpush.msra.mxu0 %v522_v29  ;;  %1380 = vmatpush.msra.mxu1 %v522_v29 }
  0x5b   : > { %1384 = vmatpush.msra.mxu2 %v521_v30  ;;  %1385 = vmatpush.msra.mxu3 %v521_v30 }
  0x5c   : > { %552 = vmatpush.msra.mxu0 %v521_v30  ;;  %1383 = vmatpush.msra.mxu1 %v521_v30 }
  0x5d   : > { %1387 = vmatpush.msra.mxu2 %v520_v33  ;;  %1388 = vmatpush.msra.mxu3 %v520_v33 }
  0x5e   : > { %553 = vmatpush.msra.mxu0 %v520_v33  ;;  %1386 = vmatpush.msra.mxu1 %v520_v33 }
  0x5f   : > { %1390 = vmatpush.msra.mxu2 %v519_v36  ;;  %1391 = vmatpush.msra.mxu3 %v519_v36 }
  0x60   : > { %579 = vmatmul.f32.vlgmr.msra.gmra.mxu2 %v1323_v37  ;;  %591 = vmatmul.f32.vlgmr.msra.gmra.mxu3 %v1331_v38 }
  0x61   : > { %554 = vmatpush.msra.mxu0 %v519_v36  ;;  %1389 = vmatpush.msra.mxu1 %v519_v36 }
  0x62   : > { %555 = vmatmul.f32.vlgmr.msra.gmra.mxu0 %v1307_v39  ;;  %567 = vmatmul.f32.vlgmr.msra.gmra.mxu1 %v1315_v40 }
  0x68   : > { %582 = vmatmul.f32.gmra.mxu2 %v1324_v41  ;;  %594 = vmatmul.f32.gmra.mxu3 %v1332_v42 }
  0x6a   : > { %558 = vmatmul.f32.gmra.mxu0 %v1308_v43  ;;  %570 = vmatmul.f32.gmra.mxu1 %v1316_v44 }
  0x70   : > { %585 = vmatmul.f32.gmra.mxu2 %v1327_v49  ;;  %597 = vmatmul.f32.gmra.mxu3 %v1335_v50 }
  0x72   : > { %561 = vmatmul.f32.gmra.mxu0 %v1311_v51  ;;  %573 = vmatmul.f32.gmra.mxu1 %v1319_v52 }
  0x78   : > { %588 = vmatmul.f32.gmra.mxu2 %v1328_v53  ;;  %600 = vmatmul.f32.gmra.mxu3 %v1336_v54 }
  0x7a   : > { %564 = vmatmul.f32.gmra.mxu0 %v1312_v55  ;;  %576 = vmatmul.f32.gmra.mxu1 %v1320_v56 }
  0xdf   : > { %v556_v58 = vpop.f32.mrf.mxu0  ;;  %v568_v59 = vpop.f32.mrf.mxu1 }
  0xe0   : > { %v557_v60 = vadd.f32 %v1522_v57, %v556_v58  ;;  %v569_v61 = vadd.f32 %v1522_v57, %v568_v59 }
  0xe2   : > { %604 = vst [vmem:[#allocation3 + $0x28] sm:$0xff] %v557_v60 }
  0xe3   : > { %608 = vst [vmem:[#allocation3 + $0x48] sm:$0xff] %v569_v61  ;;  %v580_v62 = vpop.f32.mrf.mxu2  ;;  %v592_v63 = vpop.f32.mrf.mxu3 }
  0xe4   : > { %v581_v0 = vadd.f32 %v1522_v57, %v580_v62  ;;  %v593_v1 = vadd.f32 %v1522_v57, %v592_v63 }
  0xe6   : > { %612 = vst [vmem:[#allocation3 + $0x20] sm:$0xff] %v581_v0 }
  0xe7   : > { %616 = vst [vmem:[#allocation3] sm:$0xff] %v593_v1  ;;  %v559_v2 = vpop.f32.mrf.mxu0  ;;  %v571_v3 = vpop.f32.mrf.mxu1 }
  0xe8   : > { %v560_v4 = vadd.f32 %v1522_v57, %v559_v2  ;;  %v572_v5 = vadd.f32 %v1522_v57, %v571_v3 }
  0xea   : > { %605 = vst [vmem:[#allocation3 + $0x68] sm:$0xff] %v560_v4 }
  0xeb   : > { %609 = vst [vmem:[#allocation3 + $0x30] sm:$0xff] %v572_v5  ;;  %v583_v6 = vpop.f32.mrf.mxu2  ;;  %v595_v7 = vpop.f32.mrf.mxu3 }
  0xec   : > { %v584_v8 = vadd.f32 %v1522_v57, %v583_v6  ;;  %v596_v9 = vadd.f32 %v1522_v57, %v595_v7 }
  0xee   : > { %613 = vst [vmem:[#allocation3 + $0x78] sm:$0xff] %v584_v8 }
  0xef   : > { %617 = vst [vmem:[#allocation3 + $0x8] sm:$0xff] %v596_v9  ;;  %v562_v10 = vpop.f32.mrf.mxu0  ;;  %v574_v11 = vpop.f32.mrf.mxu1 }
  0xf0   : > { %v563_v12 = vadd.f32 %v1522_v57, %v562_v10  ;;  %v575_v13 = vadd.f32 %v1522_v57, %v574_v11 }
  0xf2   : > { %606 = vst [vmem:[#allocation3 + $0x10] sm:$0xff] %v563_v12 }
  0xf3   : > { %610 = vst [vmem:[#allocation3 + $0x70] sm:$0xff] %v575_v13  ;;  %v586_v14 = vpop.f32.mrf.mxu2  ;;  %v598_v15 = vpop.f32.mrf.mxu3 }
  0xf4   : > { %v587_v16 = vadd.f32 %v1522_v57, %v586_v14  ;;  %v599_v17 = vadd.f32 %v1522_v57, %v598_v15 }
  0xf6   : > { %614 = vst [vmem:[#allocation3 + $0x18] sm:$0xff] %v587_v16 }
  0xf7   : > { %618 = vst [vmem:[#allocation3 + $0x60] sm:$0xff] %v599_v17  ;;  %v565_v18 = vpop.f32.mrf.mxu0  ;;  %v577_v19 = vpop.f32.mrf.mxu1 }
  0xf8   : > { %v566_v20 = vadd.f32 %v1522_v57, %v565_v18  ;;  %v578_v21 = vadd.f32 %v1522_v57, %v577_v19 }
  0xfa   : > { %607 = vst [vmem:[#allocation3 + $0x40] sm:$0xff] %v566_v20 }
  0xfb   : > { %611 = vst [vmem:[#allocation3 + $0x38] sm:$0xff] %v578_v21  ;;  %v589_v22 = vpop.f32.mrf.mxu2  ;;  %v601_v23 = vpop.f32.mrf.mxu3 }
  0xfc   : > { %v590_v24 = vadd.f32 %v1522_v57, %v589_v22  ;;  %v602_v25 = vadd.f32 %v1522_v57, %v601_v23 }
  0xfe   : > { %615 = vst [vmem:[#allocation3 + $0x58] sm:$0xff] %v590_v24 }
  0xff   : > { %619 = vst [vmem:[#allocation3 + $0x50] sm:$0xff] %v602_v25 }
 0x100 PF: > { %v1304_v26 = vld [vmem:[%s1710_s18 + $0x38] sm:$0xff]  ;;  %v1303_v27 = vld [vmem:[%s1710_s18 + $0x30] sm:$0xff]  ;;  %v1302_v28 = vld [vmem:[%s1710_s18 + $0x28] sm:$0xff]  ;;  %p1285_p13 = scmp.ne.s32.totalorder %s1564_s26, 1 }
 0x101   : > { %764 = vmatpush.bf16.msra.mxu0 %v1304_v26  ;;  %1392 = vmatpush.bf16.msra.mxu1 %v1304_v26  ;;  %v1301_v29 = vld [vmem:[%s1710_s18 + $0x20] sm:$0xff]  ;;  %v1300_v30 = vld [vmem:[%s1710_s18 + $0x18] sm:$0xff]  ;;  %v1299_v31 = vld [vmem:[%s1710_s18 + $0x10] sm:$0xff] }
 0x102   : > { %1393 = vmatpush.bf16.msra.mxu2 %v1304_v26  ;;  %1394 = vmatpush.bf16.msra.mxu3 %v1304_v26  ;;  %v1298_v32 = vld [vmem:[%s1710_s18 + $0x8] sm:$0xff]  ;;  %v1297_v33 = vld [vmem:[%s1710_s18] sm:$0xff]  ;;  %v1291_v35 = vld [vmem:[%s1727_s15 + $0x10] sm:$0xff] }
 0x103   : > { %v1289_v34 = vld [vmem:[%s1727_s15] sm:$0xff]  ;;  %v1295_v37 = vld [vmem:[%s1727_s15 + $0x30] sm:$0xff]  ;;  %v1290_v38 = vld [vmem:[%s1727_s15 + $0x8] sm:$0xff] }
 0x104   : > { %v1293_v36 = vld [vmem:[%s1727_s15 + $0x20] sm:$0xff]  ;;  %v1292_v39 = vld [vmem:[%s1727_s15 + $0x18] sm:$0xff]  ;;  %v1294_v40 = vld [vmem:[%s1727_s15 + $0x28] sm:$0xff] }
 0x105   : > { %765 = vmatpush.bf16.msra.mxu0 %v1303_v27  ;;  %1395 = vmatpush.bf16.msra.mxu1 %v1303_v27  ;;  %v1296_v41 = vld [vmem:[%s1727_s15 + $0x38] sm:$0xff]  ;;  %v620_v42 = vld [vmem:[#allocation2 + $0x30] sm:$0xff]  ;;  %v628_v48 = vld [vmem:[#allocation2 + $0x40] sm:$0xff] }
 0x106   : > { %1396 = vmatpush.bf16.msra.mxu2 %v1303_v27  ;;  %1397 = vmatpush.bf16.msra.mxu3 %v1303_v27  ;;  %v624_v43 = vld [vmem:[#allocation2 + $0x50] sm:$0xff]  ;;  %v632_v49 = vld [vmem:[#allocation2 + $0x60] sm:$0xff]  ;;  %v625_v51 = vld [vmem:[#allocation2 + $0x68] sm:$0xff] }
 0x107   : > { %v621_v50 = vld [vmem:[#allocation2] sm:$0xff]  ;;  %v633_v61 = vld [vmem:[#allocation2 + $0x70] sm:$0xff]  ;;  %v622_v62 = vld [vmem:[#allocation2 + $0x58] sm:$0xff] }
 0x108   : > { %v629_v60 = vld [vmem:[#allocation2 + $0x20] sm:$0xff]  ;;  %v626_v63 = vld [vmem:[#allocation2 + $0x8] sm:$0xff]  ;;  %v630_v8 = vld [vmem:[#allocation2 + $0x10] sm:$0xff] }
 0x109   : > { %766 = vmatpush.bf16.msra.mxu0 %v1302_v28  ;;  %1398 = vmatpush.bf16.msra.mxu1 %v1302_v28  ;;  %v634_v9 = vld [vmem:[#allocation2 + $0x78] sm:$0xff]  ;;  %v627_v11 = vld [vmem:[#allocation2 + $0x48] sm:$0xff] }
 0x10a   : > { %1399 = vmatpush.bf16.msra.mxu2 %v1302_v28  ;;  %1400 = vmatpush.bf16.msra.mxu3 %v1302_v28  ;;  %v623_v10 = vld [vmem:[#allocation2 + $0x18] sm:$0xff]  ;;  %v635_v21 = vld [vmem:[#allocation2 + $0x28] sm:$0xff] }
 0x10b   : > { %v631_v20 = vld [vmem:[#allocation2 + $0x38] sm:$0xff] }
 0x10d   : > { %767 = vmatpush.bf16.msra.mxu0 %v1301_v29  ;;  %1401 = vmatpush.bf16.msra.mxu1 %v1301_v29 }
 0x10e   : > { %1402 = vmatpush.bf16.msra.mxu2 %v1301_v29  ;;  %1403 = vmatpush.bf16.msra.mxu3 %v1301_v29 }
 0x111   : > { %768 = vmatpush.bf16.msra.mxu0 %v1300_v30  ;;  %1404 = vmatpush.bf16.msra.mxu1 %v1300_v30 }
 0x112   : > { %1405 = vmatpush.bf16.msra.mxu2 %v1300_v30  ;;  %1406 = vmatpush.bf16.msra.mxu3 %v1300_v30 }
 0x115   : > { %769 = vmatpush.bf16.msra.mxu0 %v1299_v31  ;;  %1407 = vmatpush.bf16.msra.mxu1 %v1299_v31 }
 0x116   : > { %1408 = vmatpush.bf16.msra.mxu2 %v1299_v31  ;;  %1409 = vmatpush.bf16.msra.mxu3 %v1299_v31 }
 0x119   : > { %770 = vmatpush.bf16.msra.mxu0 %v1298_v32  ;;  %1410 = vmatpush.bf16.msra.mxu1 %v1298_v32 }
 0x11a   : > { %1411 = vmatpush.bf16.msra.mxu2 %v1298_v32  ;;  %1412 = vmatpush.bf16.msra.mxu3 %v1298_v32 }
 0x11d   : > { %771 = vmatpush.bf16.msra.mxu0 %v1297_v33  ;;  %1413 = vmatpush.bf16.msra.mxu1 %v1297_v33 }
 0x11e   : > { %1414 = vmatpush.bf16.msra.mxu2 %v1297_v33  ;;  %1415 = vmatpush.bf16.msra.mxu3 %v1297_v33 }
 0x120   : > { %772 = vmatmul.bf16.vlgmr.msra.gmra.mxu0 %v1289_v34  ;;  %782 = vmatmul.bf16.vlgmr.msra.gmra.mxu1 %v1291_v35 }
 0x121   : > { %792 = vmatmul.bf16.vlgmr.msra.gmra.mxu2 %v1293_v36  ;;  %802 = vmatmul.bf16.vlgmr.msra.gmra.mxu3 %v1295_v37 }
 0x130   : > { %777 = vmatmul.bf16.gmra.mxu0 %v1290_v38  ;;  %787 = vmatmul.bf16.gmra.mxu1 %v1292_v39 }
 0x131   : > { %797 = vmatmul.bf16.gmra.mxu2 %v1294_v40  ;;  %807 = vmatmul.bf16.gmra.mxu3 %v1296_v41 }
 0x19d   : > { %v773_v44 = vpop.f32.mrf.mxu0  ;;  %v783_v45 = vpop.f32.mrf.mxu1 }
 0x19e   : > { %v813_v46 = vadd.f32 %v773_v44, %v620_v42  ;;  %v817_v47 = vadd.f32 %v783_v45, %v624_v43 }
 0x1a0   : > { %829 = vst [vmem:[#allocation2 + $0x30] sm:$0xff] %v813_v46 }
 0x1a1   : > { %833 = vst [vmem:[#allocation2 + $0x50] sm:$0xff] %v817_v47 }
 0x1a4   : > { %v793_v52 = vpop.f32.mrf.mxu2  ;;  %v803_v53 = vpop.f32.mrf.mxu3 }
 0x1a5   : > { %v821_v54 = vadd.f32 %v793_v52, %v628_v48  ;;  %v825_v55 = vadd.f32 %v803_v53, %v632_v49  ;;  %v775_v56 = vpop.f32.mrf.mxu0  ;;  %v785_v57 = vpop.f32.mrf.mxu1 }
 0x1a6   : > { %v814_v58 = vadd.f32 %v775_v56, %v621_v50  ;;  %v818_v59 = vadd.f32 %v785_v57, %v625_v51 }
 0x1a7   : > { %837 = vst [vmem:[#allocation2 + $0x40] sm:$0xff] %v821_v54 }
 0x1a8   : > { %841 = vst [vmem:[#allocation2 + $0x60] sm:$0xff] %v825_v55 }
 0x1a9   : > { %830 = vst [vmem:[#allocation2] sm:$0xff] %v814_v58 }
 0x1aa   : > { %834 = vst [vmem:[#allocation2 + $0x68] sm:$0xff] %v818_v59 }
 0x1ac   : > { %v795_v0 = vpop.f32.mrf.mxu2  ;;  %v805_v1 = vpop.f32.mrf.mxu3 }
 0x1ad   : > { %v822_v2 = vadd.f32 %v795_v0, %v629_v60  ;;  %v826_v3 = vadd.f32 %v805_v1, %v633_v61  ;;  %v778_v4 = vpop.f32.mrf.mxu0  ;;  %v788_v5 = vpop.f32.mrf.mxu1 }
 0x1ae   : > { %v815_v6 = vadd.f32 %v778_v4, %v622_v62  ;;  %v819_v7 = vadd.f32 %v788_v5, %v626_v63 }
 0x1af   : > { %838 = vst [vmem:[#allocation2 + $0x20] sm:$0xff] %v822_v2 }
 0x1b0   : > { %842 = vst [vmem:[#allocation2 + $0x70] sm:$0xff] %v826_v3 }
 0x1b1   : > { %831 = vst [vmem:[#allocation2 + $0x58] sm:$0xff] %v815_v6 }
 0x1b2   : > { %835 = vst [vmem:[#allocation2 + $0x8] sm:$0xff] %v819_v7 }
 0x1b4   : > { %v798_v12 = vpop.f32.mrf.mxu2  ;;  %v808_v13 = vpop.f32.mrf.mxu3 }
 0x1b5   : > { %v823_v14 = vadd.f32 %v798_v12, %v630_v8  ;;  %v827_v15 = vadd.f32 %v808_v13, %v634_v9  ;;  %v780_v16 = vpop.f32.mrf.mxu0  ;;  %v790_v17 = vpop.f32.mrf.mxu1 }
 0x1b6   : > { %v816_v18 = vadd.f32 %v780_v16, %v623_v10  ;;  %v820_v19 = vadd.f32 %v790_v17, %v627_v11 }
 0x1b7   : > { %839 = vst [vmem:[#allocation2 + $0x10] sm:$0xff] %v823_v14 }
 0x1b8   : > { %843 = vst [vmem:[#allocation2 + $0x78] sm:$0xff] %v827_v15 }
 0x1b9   : > { %832 = vst [vmem:[#allocation2 + $0x18] sm:$0xff] %v816_v18 }
 0x1ba   : > { %836 = vst [vmem:[#allocation2 + $0x48] sm:$0xff] %v820_v19 }
 0x1bc   : > { %v800_v22 = vpop.f32.mrf.mxu2  ;;  %v810_v23 = vpop.f32.mrf.mxu3  ;;  %848 = sbr.rel (%p1285_p13) target bundleno = 738 (0x2e2), region = 97 }
 0x1bd   : > { %v824_v24 = vadd.f32 %v800_v22, %v631_v20  ;;  %v828_v25 = vadd.f32 %v810_v23, %v635_v21 }
 0x1bf   : > { %840 = vst [vmem:[#allocation2 + $0x38] sm:$0xff] %v824_v24 }
 0x1c0   : > { %844 = vst [vmem:[#allocation2 + $0x28] sm:$0xff] %v828_v25 }
 0x1c1   : > { %v874_v26 = vld [vmem:[%s1720_s27 + $0x48] sm:$0xff]  ;;  %v873_v27 = vld [vmem:[%s1720_s27 + $0x40] sm:$0xff]  ;;  %v1583_v29 = vmov 0   ;;  %v992_v33 = vld [vmem:[%s1911_s4 + $0x78] sm:$0xff] }
 0x1c2   : > { %v865_v28 = vld [vmem:[%s1720_s27] sm:$0xff]  ;;  %1525 = vset.pattern.permute.xlu2 %v1583_v29  ;;  %1524 = vset.pattern.permute.xlu1 %v1583_v29  ;;  %v878_v30 = vld [vmem:[%s1720_s27 + $0x68] sm:$0xff]  ;;  %v991_v34 = vld [vmem:[%s1911_s4 + $0x70] sm:$0xff] }
 0x1c3   : > { %1523 = vset.pattern.permute.xlu0 %v1583_v29  ;;  %928 = vperm.xlu2 %1525, %v874_v26   ;;  %v877_v31 = vld [vmem:[%s1720_s27 + $0x60] sm:$0xff]  ;;  %v990_v35 = vld [vmem:[%s1911_s4 + $0x68] sm:$0xff]  ;;  %v875_v36 = vld [vmem:[%s1720_s27 + $0x50] sm:$0xff] }
 0x1c4   : > { %923 = vperm.xlu0 %1523, %v873_v27   ;;  %883 = vperm.xlu1 %1524, %v865_v28   ;;  %v869_v32 = vld [vmem:[%s1720_s27 + $0x20] sm:$0xff]  ;;  %v866_v37 = vld [vmem:[%s1720_s27 + $0x8] sm:$0xff]  ;;  %v871_v39 = vld [vmem:[%s1720_s27 + $0x30] sm:$0xff] }
 0x1c5   : > { %1417 = vmatpush.msra.mxu2 %v992_v33  ;;  %1009 = vmatpush.msra.mxu0 %v992_v33  ;;  %v870_v38 = vld [vmem:[%s1720_s27 + $0x28] sm:$0xff]  ;;  %v879_v40 = vld [vmem:[%s1720_s27 + $0x70] sm:$0xff]  ;;  %v868_v42 = vld [vmem:[%s1720_s27 + $0x18] sm:$0xff] }
 0x1c6   : > { %1416 = vmatpush.msra.mxu1 %v992_v33  ;;  %1418 = vmatpush.msra.mxu3 %v992_v33  ;;  %v867_v41 = vld [vmem:[%s1720_s27 + $0x10] sm:$0xff]  ;;  %v876_v43 = vld [vmem:[%s1720_s27 + $0x58] sm:$0xff]  ;;  %v989_v46 = vld [vmem:[%s1911_s4 + $0x60] sm:$0xff] }
 0x1c7   : > { %1420 = vmatpush.msra.mxu2 %v991_v34  ;;  %1010 = vmatpush.msra.mxu0 %v991_v34  ;;  %v880_v44 = vld [vmem:[%s1720_s27 + $0x78] sm:$0xff]  ;;  %v987_v48 = vld [vmem:[%s1911_s4 + $0x50] sm:$0xff]  ;;  %v986_v49 = vld [vmem:[%s1911_s4 + $0x48] sm:$0xff] }
 0x1c8   : > { %1419 = vmatpush.msra.mxu1 %v991_v34  ;;  %1421 = vmatpush.msra.mxu3 %v991_v34  ;;  %v872_v45 = vld [vmem:[%s1720_s27 + $0x38] sm:$0xff]  ;;  %v985_v50 = vld [vmem:[%s1911_s4 + $0x40] sm:$0xff]  ;;  %v983_v52 = vld [vmem:[%s1911_s4 + $0x30] sm:$0xff] }
 0x1c9   : > { %1423 = vmatpush.msra.mxu2 %v990_v35  ;;  %1011 = vmatpush.msra.mxu0 %v990_v35  ;;  %v988_v47 = vld [vmem:[%s1911_s4 + $0x58] sm:$0xff]  ;;  %v982_v53 = vld [vmem:[%s1911_s4 + $0x28] sm:$0xff]  ;;  %v981_v54 = vld [vmem:[%s1911_s4 + $0x20] sm:$0xff] }
 0x1ca   : > { %1422 = vmatpush.msra.mxu1 %v990_v35  ;;  %1424 = vmatpush.msra.mxu3 %v990_v35  ;;  %v984_v51 = vld [vmem:[%s1911_s4 + $0x38] sm:$0xff]  ;;  %v979_v56 = vld [vmem:[%s1911_s4 + $0x10] sm:$0xff]  ;;  %v978_v57 = vld [vmem:[%s1911_s4 + $0x8] sm:$0xff] }
 0x1cb   : > { %948 = vperm.xlu2 %1525, %v878_v30   ;;  %1426 = vmatpush.msra.mxu2 %v989_v46  ;;  %v980_v55 = vld [vmem:[%s1911_s4 + $0x18] sm:$0xff]  ;;  %v977_v58 = vld [vmem:[%s1911_s4] sm:$0xff]  ;;  %v849_v61 = vld [vmem:[#allocation2 + $0x30] sm:$0xff] }
 0x1cc   : > { %943 = vperm.xlu0 %1523, %v877_v31   ;;  %903 = vperm.xlu1 %1524, %v869_v32   ;;  %v857_v60 = vld [vmem:[#allocation2 + $0x40] sm:$0xff]  ;;  %v853_v5 = vld [vmem:[#allocation2 + $0x50] sm:$0xff]  ;;  %v854_v13 = vld [vmem:[#allocation2 + $0x68] sm:$0xff] }
 0x1cd   : > { %1012 = vmatpush.msra.mxu0 %v989_v46  ;;  %1425 = vmatpush.msra.mxu1 %v989_v46  ;;  %v858_v3 = vld [vmem:[#allocation2 + $0x20] sm:$0xff]  ;;  %v862_v14 = vld [vmem:[#allocation2 + $0x70] sm:$0xff]  ;;  %v855_v23 = vld [vmem:[#allocation2 + $0x8] sm:$0xff] }
 0x1ce   : > { %1427 = vmatpush.msra.mxu3 %v989_v46  ;;  %1429 = vmatpush.msra.mxu2 %v988_v47  ;;  %v861_v4 = vld [vmem:[#allocation2 + $0x60] sm:$0xff]  ;;  %v859_v15 = vld [vmem:[#allocation2 + $0x10] sm:$0xff]  ;;  %v863_v24 = vld [vmem:[#allocation2 + $0x78] sm:$0xff] }
 0x1cf   : > { %1013 = vmatpush.msra.mxu0 %v988_v47  ;;  %1428 = vmatpush.msra.mxu1 %v988_v47  ;;  %v850_v12 = vld [vmem:[#allocation2] sm:$0xff]  ;;  %v851_v25 = vld [vmem:[#allocation2 + $0x58] sm:$0xff]  ;;  %v864_v34 = vld [vmem:[#allocation2 + $0x28] sm:$0xff] }
 0x1d0   : > { %1430 = vmatpush.msra.mxu3 %v988_v47  ;;  %1432 = vmatpush.msra.mxu2 %v987_v48  ;;  %v852_v32 = vld [vmem:[#allocation2 + $0x18] sm:$0xff]  ;;  %v1001_v46 = vld [vmem:[#allocation3 + $0x20] sm:$0xff] }
 0x1d1   : > { %1014 = vmatpush.msra.mxu0 %v987_v48  ;;  %1431 = vmatpush.msra.mxu1 %v987_v48  ;;  %v860_v33 = vld [vmem:[#allocation2 + $0x38] sm:$0xff] }
 0x1d2   : > { %1433 = vmatpush.msra.mxu3 %v987_v48  ;;  %1435 = vmatpush.msra.mxu2 %v986_v49  ;;  %v997_v48 = vld [vmem:[#allocation3 + $0x48] sm:$0xff] }
 0x1d3   : > { %933 = vperm.xlu2 %1525, %v875_v36   ;;  %1015 = vmatpush.msra.mxu0 %v986_v49 }
 0x1d4   : > { %888 = vperm.xlu0 %1523, %v866_v37   ;;  %908 = vperm.xlu1 %1524, %v870_v38  }
 0x1d5   : > { %1434 = vmatpush.msra.mxu1 %v986_v49  ;;  %1436 = vmatpush.msra.mxu3 %v986_v49 }
 0x1d6   : > { %1438 = vmatpush.msra.mxu2 %v985_v50  ;;  %1016 = vmatpush.msra.mxu0 %v985_v50 }
 0x1d7   : > { %1437 = vmatpush.msra.mxu1 %v985_v50  ;;  %1439 = vmatpush.msra.mxu3 %v985_v50 }
 0x1d8   : > { %1441 = vmatpush.msra.mxu2 %v984_v51  ;;  %1017 = vmatpush.msra.mxu0 %v984_v51 }
 0x1d9   : > { %1440 = vmatpush.msra.mxu1 %v984_v51  ;;  %1442 = vmatpush.msra.mxu3 %v984_v51 }
 0x1da   : > { %1444 = vmatpush.msra.mxu2 %v983_v52  ;;  %1018 = vmatpush.msra.mxu0 %v983_v52 }
 0x1db   : > { %913 = vperm.xlu2 %1525, %v871_v39   ;;  %1443 = vmatpush.msra.mxu1 %v983_v52 }
 0x1dc   : > { %953 = vperm.xlu0 %1523, %v879_v40   ;;  %893 = vperm.xlu1 %1524, %v867_v41   ;;  %v856_v40 = vld [vmem:[#allocation2 + $0x48] sm:$0xff] }
 0x1dd   : > { %1445 = vmatpush.msra.mxu3 %v983_v52  ;;  %1447 = vmatpush.msra.mxu2 %v982_v53  ;;  %v1002_v52 = vld [vmem:[#allocation3 + $0x78] sm:$0xff] }
 0x1de   : > { %1019 = vmatpush.msra.mxu0 %v982_v53  ;;  %1446 = vmatpush.msra.mxu1 %v982_v53 }
 0x1df   : > { %1448 = vmatpush.msra.mxu3 %v982_v53  ;;  %1450 = vmatpush.msra.mxu2 %v981_v54  ;;  %v1005_v53 = vld [vmem:[#allocation3] sm:$0xff] }
 0x1e0   : > { %1020 = vmatpush.msra.mxu0 %v981_v54  ;;  %1449 = vmatpush.msra.mxu1 %v981_v54 }
 0x1e1   : > { %1451 = vmatpush.msra.mxu3 %v981_v54  ;;  %1453 = vmatpush.msra.mxu2 %v980_v55 }
 0x1e2   : > { %1021 = vmatpush.msra.mxu0 %v980_v55  ;;  %1452 = vmatpush.msra.mxu1 %v980_v55 }
 0x1e3   : > { %898 = vperm.xlu2 %1525, %v868_v42   ;;  %1454 = vmatpush.msra.mxu3 %v980_v55  ;;  %v994_v55 = vld [vmem:[#allocation3 + $0x68] sm:$0xff] }
 0x1e4   : > { %938 = vperm.xlu0 %1523, %v876_v43   ;;  %958 = vperm.xlu1 %1524, %v880_v44   ;;  %v993_v43 = vld [vmem:[#allocation3 + $0x28] sm:$0xff] }
 0x1e5   : > { %1456 = vmatpush.msra.mxu2 %v979_v56  ;;  %1022 = vmatpush.msra.mxu0 %v979_v56 }
 0x1e6   : > { %1455 = vmatpush.msra.mxu1 %v979_v56  ;;  %1457 = vmatpush.msra.mxu3 %v979_v56  ;;  %v998_v56 = vld [vmem:[#allocation3 + $0x30] sm:$0xff] }
 0x1e7   : > { %1459 = vmatpush.msra.mxu2 %v978_v57  ;;  %1023 = vmatpush.msra.mxu0 %v978_v57 }
 0x1e8   : > { %1458 = vmatpush.msra.mxu1 %v978_v57  ;;  %1460 = vmatpush.msra.mxu3 %v978_v57 }
 0x1e9   : > { %1462 = vmatpush.msra.mxu2 %v977_v58  ;;  %1024 = vmatpush.msra.mxu0 %v977_v58 }
 0x1ea   : > { %1461 = vmatpush.msra.mxu1 %v977_v58  ;;  %1463 = vmatpush.msra.mxu3 %v977_v58 }
 0x1ec   : > { %918 = vperm.xlu0 %1523, %v872_v45  }
 0x21d   : > { %v929_v59 = vpop.permute.xlu2 %928 }
 0x21e   : > { %v970_v6 = vmul.f32 %v929_v59, %v858_v3  ;;  %v999_v3 = vld [vmem:[#allocation3 + $0x70] sm:$0xff] }
 0x225   : > { %v949_v62 = vpop.permute.xlu2 %948 }
 0x226   : > { %v974_v20 = vmul.f32 %v949_v62, %v862_v14 }
 0x22d   : > { %v934_v11 = vpop.permute.xlu2 %933 }
 0x22e   : > { %v971_v21 = vmul.f32 %v934_v11, %v859_v15 }
 0x235   : > { %v914_v22 = vpop.permute.xlu2 %913 }
 0x236   : > { %v924_v63 = vpop.permute.xlu0 %923  ;;  %v884_v0 = vpop.permute.xlu1 %883  ;;  %v967_v28 = vmul.f32 %v914_v22, %v855_v23 }
 0x237   : > { %v969_v1 = vmul.f32 %v924_v63, %v857_v60  ;;  %v961_v2 = vmul.f32 %v884_v0, %v849_v61  ;;  %v1003_v0 = vld [vmem:[#allocation3 + $0x18] sm:$0xff] }
 0x239   : > { %1049 = vmatmul.f32.vlgmr.msra.gmra.mxu2 %v969_v1  ;;  %1025 = vmatmul.f32.vlgmr.msra.gmra.mxu0 %v961_v2  ;;  %v1006_v1 = vld [vmem:[#allocation3 + $0x8] sm:$0xff]  ;;  %v995_v2 = vld [vmem:[#allocation3 + $0x10] sm:$0xff] }
 0x23d   : > { %v899_v31 = vpop.permute.xlu2 %898 }
 0x23e   : > { %v944_v7 = vpop.permute.xlu0 %943  ;;  %v904_v8 = vpop.permute.xlu1 %903  ;;  %v964_v37 = vmul.f32 %v899_v31, %v852_v32 }
 0x23f   : > { %v973_v9 = vmul.f32 %v944_v7, %v861_v4  ;;  %v965_v10 = vmul.f32 %v904_v8, %v853_v5 }
 0x241   : > { %1037 = vmatmul.f32.vlgmr.msra.gmra.mxu1 %v965_v10  ;;  %1052 = vmatmul.f32.gmra.mxu2 %v970_v6 }
 0x242   : > { %1061 = vmatmul.f32.vlgmr.msra.gmra.mxu3 %v973_v9 }
 0x246   : > { %v889_v16 = vpop.permute.xlu0 %888  ;;  %v909_v17 = vpop.permute.xlu1 %908 }
 0x247   : > { %v962_v18 = vmul.f32 %v889_v16, %v850_v12  ;;  %v966_v19 = vmul.f32 %v909_v17, %v854_v13  ;;  %v1007_v12 = vld [vmem:[#allocation3 + $0x60] sm:$0xff] }
 0x248   : > { %v996_v13 = vld [vmem:[#allocation3 + $0x40] sm:$0xff] }
 0x249   : > { %1028 = vmatmul.f32.gmra.mxu0 %v962_v18  ;;  %1040 = vmatmul.f32.gmra.mxu1 %v966_v19  ;;  %v1004_v18 = vld [vmem:[#allocation3 + $0x58] sm:$0xff]  ;;  %v1008_v19 = vld [vmem:[#allocation3 + $0x50] sm:$0xff] }
 0x24a   : > { %1055 = vmatmul.f32.gmra.mxu2 %v971_v21  ;;  %1064 = vmatmul.f32.gmra.mxu3 %v974_v20  ;;  %v1000_v21 = vld [vmem:[#allocation3 + $0x38] sm:$0xff] }
 0x24e   : > { %v954_v26 = vpop.permute.xlu0 %953  ;;  %v894_v27 = vpop.permute.xlu1 %893 }
 0x24f   : > { %v975_v29 = vmul.f32 %v954_v26, %v863_v24  ;;  %v963_v30 = vmul.f32 %v894_v27, %v851_v25 }
 0x251   : > { %1031 = vmatmul.f32.gmra.mxu0 %v963_v30  ;;  %1043 = vmatmul.f32.gmra.mxu1 %v967_v28 }
 0x252   : > { %1067 = vmatmul.f32.gmra.mxu3 %v975_v29 }
 0x256   : > { %v939_v35 = vpop.permute.xlu0 %938  ;;  %v959_v36 = vpop.permute.xlu1 %958 }
 0x257   : > { %v972_v38 = vmul.f32 %v939_v35, %v860_v33  ;;  %v976_v39 = vmul.f32 %v959_v36, %v864_v34 }
 0x259   : > { %1034 = vmatmul.f32.gmra.mxu0 %v964_v37  ;;  %1058 = vmatmul.f32.gmra.mxu2 %v972_v38 }
 0x25a   : > { %1070 = vmatmul.f32.gmra.mxu3 %v976_v39 }
 0x25e   : > { %v919_v41 = vpop.permute.xlu0 %918 }
 0x25f   : > { %v968_v42 = vmul.f32 %v919_v41, %v856_v40 }
 0x261   : > { %1046 = vmatmul.f32.gmra.mxu1 %v968_v42 }
 0x2b6   : > { %v1026_v44 = vpop.f32.mrf.mxu0 }
 0x2b7   : > { %v1027_v45 = vadd.f32 %v1026_v44, %v993_v43 }
 0x2b9   : > { %1074 = vst [vmem:[%s1725_s9] sm:$0xff] %v1027_v45 }
 0x2bc   : > { %v1050_v47 = vpop.f32.mrf.mxu2 }
 0x2bd   : > { %v1051_v49 = vadd.f32 %v1050_v47, %v1001_v46 }
 0x2be   : > { %v1038_v50 = vpop.f32.mrf.mxu1 }
 0x2bf   : > { %1082 = vst [vmem:[%s1725_s9 + $0x40] sm:$0xff] %v1051_v49  ;;  %v1039_v51 = vadd.f32 %v1038_v50, %v997_v48 }
 0x2c1   : > { %1078 = vst [vmem:[%s1725_s9 + $0x20] sm:$0xff] %v1039_v51 }
 0x2c4   : > { %v1053_v54 = vpop.f32.mrf.mxu2 }
 0x2c5   : > { %v1054_v57 = vadd.f32 %v1053_v54, %v1002_v52  ;;  %v1062_v58 = vpop.f32.mrf.mxu3 }
 0x2c6   : > { %v1063_v59 = vadd.f32 %v1062_v58, %v1005_v53  ;;  %v1029_v60 = vpop.f32.mrf.mxu0  ;;  %v1041_v61 = vpop.f32.mrf.mxu1 }
 0x2c7   : > { %1083 = vst [vmem:[%s1725_s9 + $0x48] sm:$0xff] %v1054_v57  ;;  %v1030_v62 = vadd.f32 %v1029_v60, %v994_v55  ;;  %v1042_v63 = vadd.f32 %v1041_v61, %v998_v56 }
 0x2c8   : > { %1086 = vst [vmem:[%s1725_s9 + $0x60] sm:$0xff] %v1063_v59 }
 0x2c9   : > { %1075 = vst [vmem:[%s1725_s9 + $0x8] sm:$0xff] %v1030_v62 }
 0x2ca   : > { %1079 = vst [vmem:[%s1725_s9 + $0x28] sm:$0xff] %v1042_v63 }
 0x2cd   : > { %v1056_v4 = vpop.f32.mrf.mxu2  ;;  %v1065_v5 = vpop.f32.mrf.mxu3 }
 0x2ce   : > { %v1057_v6 = vadd.f32 %v1056_v4, %v1003_v0  ;;  %v1066_v7 = vadd.f32 %v1065_v5, %v1006_v1  ;;  %v1032_v8 = vpop.f32.mrf.mxu0  ;;  %v1044_v9 = vpop.f32.mrf.mxu1 }
 0x2cf   : > { %v1033_v10 = vadd.f32 %v1032_v8, %v995_v2  ;;  %v1045_v11 = vadd.f32 %v1044_v9, %v999_v3 }
 0x2d0   : > { %1084 = vst [vmem:[%s1725_s9 + $0x50] sm:$0xff] %v1057_v6 }
 0x2d1   : > { %1087 = vst [vmem:[%s1725_s9 + $0x68] sm:$0xff] %v1066_v7 }
 0x2d2   : > { %1076 = vst [vmem:[%s1725_s9 + $0x10] sm:$0xff] %v1033_v10 }
 0x2d3   : > { %1080 = vst [vmem:[%s1725_s9 + $0x30] sm:$0xff] %v1045_v11 }
 0x2d5   : > { %v1068_v14 = vpop.f32.mrf.mxu3 }
 0x2d6   : > { %v1069_v15 = vadd.f32 %v1068_v14, %v1007_v12  ;;  %v1035_v16 = vpop.f32.mrf.mxu0 }
 0x2d7   : > { %v1036_v17 = vadd.f32 %v1035_v16, %v996_v13 }
 0x2d8   : > { %1088 = vst [vmem:[%s1725_s9 + $0x70] sm:$0xff] %v1069_v15 }
 0x2d9   : > { %1077 = vst [vmem:[%s1725_s9 + $0x18] sm:$0xff] %v1036_v17 }
 0x2dc   : > { %v1059_v20 = vpop.f32.mrf.mxu2 }
 0x2dd   : > { %v1060_v22 = vadd.f32 %v1059_v20, %v1004_v18  ;;  %v1071_v23 = vpop.f32.mrf.mxu3 }
 0x2de   : > { %v1072_v24 = vadd.f32 %v1071_v23, %v1008_v19  ;;  %v1047_v25 = vpop.f32.mrf.mxu1 }
 0x2df   : > { %1085 = vst [vmem:[%s1725_s9 + $0x58] sm:$0xff] %v1060_v22  ;;  %v1048_v26 = vadd.f32 %v1047_v25, %v1000_v21 }
 0x2e0   : > { %1089 = vst [vmem:[%s1725_s9 + $0x78] sm:$0xff] %v1072_v24 }
 0x2e1   : > { %1081 = vst [vmem:[%s1725_s9 + $0x38] sm:$0xff] %v1048_v26 }
 0x2e2 PF: > { %s17_s30 = sadd.s32 1, %s1580_s30   ;;  %s1919_s22 = sld [smem:[#allocation5_spill]] }
 0x2e3   : > { %p14_p0 = scmp.ge.s32.totalorder %s17_s30, 6   ;;  %s1920_s24 = smov %s1560_s25 }
 0x2e4   : > { %s1921_s25 = smov %s1675_s14  ;;  %s1922_s26 = smov %s1572_s28 }
 0x2e5   : > { %s1923_s27 = smov %s1576_s29  ;;  %s1924_s28 = smov %s1927_s8 }
 0x2e6   :  { %16 = sbr.rel (!%p14_p0) target bundleno = 6 (0x6), region = 141 }
 0x2e8   : > { %s1925_s29 = smov %s1919_s22 }

// kernel: gnn_forward.2
= control target key start
LH: loop header
LB: loop body
LE: loop exit
PB: predicated region body
PF: predicated region fallthrough
CT: control target
= control target key end

     0   :  { %s1978_s0 = inlined_call_operand.vmem [shape: bf16[256,256], index: 0, kind: input, shape index: {}]   ;;  %s1979_s1 = inlined_call_operand.vmem [shape: bf16[256,128], index: 1, kind: input, shape index: {}, may-alias: {1,2}]   ;;  %s1980_s2 = inlined_call_operand.vmem [shape: bf16[256,128], index: 2, kind: input, shape index: {}, may-alias: {1,2}]   ;;  %s1981_s3 = inlined_call_operand.vmem [shape: f32[256,1], index: 3, kind: input, shape index: {}]   ;;  %s1982_s4 = inlined_call_operand.vmem [shape: f32[128,128], index: 4, kind: input, shape index: {}]   ;;  %s1983_s5 = inlined_call_operand.vmem [shape: f32[128,128], index: 5, kind: input, shape index: {}]   ;;  %s1984_s6 = inlined_call_operand.vmem [shape: f32[1,128], index: 6, kind: input, shape index: {}]   ;;  %s1985_s7 = inlined_call_operand.vmem [shape: bf16[256,128], index: 7, kind: output, shape index: {}]  }
   0x1   :  { %1987 = sst [smem:[#allocation6_spill]] %s1978_s0 }
   0x2   :  { %s1703_s24 = smov 0   ;;  %s1705_s25 = smov 0  }
   0x3   :  { %s1707_s26 = smov 0   ;;  %s1709_s27 = smov 0  }
   0x4   :  { %s1711_s28 = smov 0   ;;  %s1713_s29 = smov 0  }
   0x5   :  { %s1715_s30 = smov 0  }
   0x6 LB: > { %s26_s8 = sadd.s32 1, %s1651_s28  ;;  %s29_s9 = sadd.s32 1, %s1655_s29  ;;  %s1659_s30 = sphi %s1715_s30, %s17_s30   ;;  %s1655_s29 = sphi %s1713_s29, %s1996_s29   ;;  %s1651_s28 = sphi %s1711_s28, %s1995_s28   ;;  %s1647_s27 = sphi %s1709_s27, %s1994_s27   ;;  %s1643_s26 = sphi %s1707_s26, %s1993_s26   ;;  %s1639_s25 = sphi %s1705_s25, %s1992_s25   ;;  %s1635_s24 = sphi %s1703_s24, %s1991_s24  }
   0x7   : > { %p27_p0 = scmp.ge.s32.totalorder %s26_s8, 2  ;;  %p45_p1 = scmp.ne.s32.totalorder %s1639_s25, %s1635_s24 }
   0x8   : > { %p46_p2 = scmp.eq.s32.totalorder %s1659_s30, 0  ;;  %s38_s13 = sadd.s32 1, %s1639_s25 }
   0x9   : > { %s1998_s8 = smov (%p27_p0, %s26_s8), 0  ;;  %s2000_s9 = smov (!%p27_p0, %s29_s9), %s1655_s29 }
   0xa   : > { %p47_p3 = por %p46_p2, %p45_p1  ;;  %p31_p4 = scmp.ge.s32.totalorder %s2000_s9, 2 }
   0xb   : > { %s34_s10 = ssub.s32 %s1651_s28, %s1998_s8  ;;  %p1237_p6 = scmp.ge.s32.totalorder %s1659_s30, 4 }
   0xc   : > { %s2002_s9 = smov (%p31_p4, %s2000_s9), 0 }
   0xd   : > { %1988 = sst [smem:[#allocation5_spill]] %s2002_s9  ;;  %s33_s11 = ssub.s32 %s1655_s29, %s2002_s9 }
   0xe   : > { %s35_s12 = sor.u32 %s34_s10, %s33_s11  ;;  %247 = sbr.rel (%p1237_p6) target bundleno = 45 (0x2d), region = 28 }
   0xf   : > { %p36_p5 = scmp.eq.s32.totalorder %s35_s12, 0 }
  0x11   : > { %s1754_s14 = scalar_select %p36_p5, %s1639_s25, %s38_s13  }
  0x13   : > { %250 = sbr.rel (!%p47_p3) target bundleno = 45 (0x2d), region = 32  ;;  %s252_s15 = sand.u32 (%p47_p3), 1, %s1639_s25  }
  0x14   : > { %s1320_s16 = sshll.u32 (%p47_p3), %s1655_s29, 5  ;;  %s1238_s17 = sshll.u32 (%p47_p3), %s252_s15, 6 }
  0x15   : > { %s257_s18 = sadd.s32 (%p47_p3), %s1651_s28, %s1320_s16  ;;  %s1989_s0 = sld [smem:[#allocation6_spill]] (%p47_p3) }
  0x16   : > { %s1241_s19 = sshll.u32 (%p47_p3), %s257_s18, 2  ;;  %s254_s23 = scalar_lea.vmem (%p47_p3), [#allocation4], %s1238_s17 }
  0x1b   : > { %s1763_s22 = scalar_lea.vmem %s1989_s0, %s1241_s19 }
  0x1c   : > { %v276_v0 = vld [vmem:[%s1763_s22] sm:$0xf]  ;;  %v278_v1 = vld [vmem:[%s1763_s22 + $0x8] sm:$0xf]  ;;  %v280_v2 = vld [vmem:[%s1763_s22 + $0x10] sm:$0xf] }
  0x1d   : > { %277 = vst [vmem:[%s254_s23] sm:$0xf] %v276_v0  ;;  %v282_v3 = vld [vmem:[%s1763_s22 + $0x18] sm:$0xf]  ;;  %v284_v4 = vld [vmem:[%s1763_s22 + $0x20] sm:$0xf] }
  0x1e   : > { %279 = vst [vmem:[%s254_s23 + $0x4] sm:$0xf] %v278_v1  ;;  %v286_v5 = vld [vmem:[%s1763_s22 + $0x28] sm:$0xf]  ;;  %v288_v6 = vld [vmem:[%s1763_s22 + $0x30] sm:$0xf] }
  0x1f   : > { %281 = vst [vmem:[%s254_s23 + $0x8] sm:$0xf] %v280_v2  ;;  %v290_v7 = vld [vmem:[%s1763_s22 + $0x38] sm:$0xf]  ;;  %v292_v8 = vld [vmem:[%s1763_s22 + $0x40] sm:$0xf] }
  0x20   : > { %283 = vst [vmem:[%s254_s23 + $0xc] sm:$0xf] %v282_v3  ;;  %v294_v9 = vld [vmem:[%s1763_s22 + $0x48] sm:$0xf]  ;;  %v296_v10 = vld [vmem:[%s1763_s22 + $0x50] sm:$0xf] }
  0x21   : > { %285 = vst [vmem:[%s254_s23 + $0x10] sm:$0xf] %v284_v4  ;;  %v298_v11 = vld [vmem:[%s1763_s22 + $0x58] sm:$0xf]  ;;  %v300_v12 = vld [vmem:[%s1763_s22 + $0x60] sm:$0xf] }
  0x22   : > { %287 = vst [vmem:[%s254_s23 + $0x14] sm:$0xf] %v286_v5  ;;  %v302_v13 = vld [vmem:[%s1763_s22 + $0x68] sm:$0xf]  ;;  %v304_v14 = vld [vmem:[%s1763_s22 + $0x70] sm:$0xf] }
  0x23   : > { %289 = vst [vmem:[%s254_s23 + $0x18] sm:$0xf] %v288_v6  ;;  %v306_v15 = vld [vmem:[%s1763_s22 + $0x78] sm:$0xf] }
  0x24   : > { %291 = vst [vmem:[%s254_s23 + $0x1c] sm:$0xf] %v290_v7 }
  0x25   : > { %293 = vst [vmem:[%s254_s23 + $0x20] sm:$0xf] %v292_v8 }
  0x26   : > { %295 = vst [vmem:[%s254_s23 + $0x24] sm:$0xf] %v294_v9 }
  0x27   : > { %297 = vst [vmem:[%s254_s23 + $0x28] sm:$0xf] %v296_v10 }
  0x28   : > { %299 = vst [vmem:[%s254_s23 + $0x2c] sm:$0xf] %v298_v11 }
  0x29   : > { %301 = vst [vmem:[%s254_s23 + $0x30] sm:$0xf] %v300_v12 }
  0x2a   : > { %303 = vst [vmem:[%s254_s23 + $0x34] sm:$0xf] %v302_v13 }
  0x2b   : > { %305 = vst [vmem:[%s254_s23 + $0x38] sm:$0xf] %v304_v14 }
  0x2c   : > { %307 = vst [vmem:[%s254_s23 + $0x3c] sm:$0xf] %v306_v15 }
  0x2d PF: > { %p1242_p7 = scmp.ge.s32.totalorder %s1659_s30, 1  ;;  %p389_p8 = scmp.lt.s32.totalorder %s1659_s30, 5 }
  0x2f   : > { %p390_p9 = pnand %p1242_p7, %p389_p8 }
  0x30   : > { %s396_s10 = sand.u32 (!%p390_p9), 1, %s1635_s24   ;;  %s1244_s11 = sshll.u32 (!%p390_p9), %s1643_s26, 4 }
  0x31   : > { %393 = sbr.rel (%p390_p9) target bundleno = 742 (0x2e6), region = 85  ;;  %s1243_s12 = sshll.u32 (!%p390_p9), %s396_s10, 6 }
  0x32   : > { %p444_p10 = scmp.lt.s32.totalorder (!%p390_p9), %s1244_s11, 31  ;;  %s1246_s13 = sshll.u32 (!%p390_p9), %s1647_s27, 4 }
  0x33   : > { %p450_p11 = scmp.lt.s32.totalorder (!%p390_p9), %s1246_s13, 31  ;;  %p1252_p12 = scmp.ne.s32.totalorder (!%p390_p9), %s1643_s26, 0 }
  0x36   : > { %s2004_s11 = smov (!%p444_p10, %s1244_s11), 31  ;;  %s2006_s13 = smov (!%p450_p11, %s1246_s13), 31 }
  0x37   : > { %s1245_s15 = sshll.u32 %s2004_s11, 2  ;;  %s1247_s19 = sshll.u32 %s2006_s13, 2 }
  0x38   : > { %s1789_s18 = scalar_lea.vmem %s1979_s1, %s1245_s15  ;;  %s1249_s20 = sshll.u32 %s2006_s13, 3 }
  0x39   : > { %s1794_s23 = scalar_lea.vmem %s1980_s2, %s1247_s19  ;;  %s1799_s27 = scalar_lea.vmem %s1981_s3, %s1249_s20 }
  0x3a   : > { %s1804_s9 = scalar_lea.vmem %s1985_s7, %s1247_s19  ;;  %s1806_s15 = scalar_lea.vmem [#allocation4], %s1243_s12 }
  0x3b   : > { %470 = sbr.rel (%p1252_p12) target bundleno = 256 (0x100), region = 93 }
  0x40   : > { %v534_v16 = vld [vmem:[%s1983_s5 + $0x78] sm:$0xff]  ;;  %v533_v17 = vld [vmem:[%s1983_s5 + $0x70] sm:$0xff]  ;;  %v1661_v18 = vmov 0.0   ;;  %v532_v19 = vld [vmem:[%s1983_s5 + $0x68] sm:$0xff] }
  0x41   : > { %1424 = vmatpush.msra.mxu2 %v534_v16  ;;  %1425 = vmatpush.msra.mxu3 %v534_v16  ;;  %471 = vst [vmem:[#allocation2 + $0x30] sm:$0xff] %v1661_v18  ;;  %v531_v20 = vld [vmem:[%s1983_s5 + $0x60] sm:$0xff]  ;;  %v530_v21 = vld [vmem:[%s1983_s5 + $0x58] sm:$0xff]  ;;  %v529_v22 = vld [vmem:[%s1983_s5 + $0x50] sm:$0xff] }
  0x42   : > { %472 = vst [vmem:[#allocation2] sm:$0xff] %v1661_v18  ;;  %539 = vmatpush.msra.mxu0 %v534_v16  ;;  %1423 = vmatpush.msra.mxu1 %v534_v16  ;;  %v528_v23 = vld [vmem:[%s1983_s5 + $0x48] sm:$0xff]  ;;  %v527_v24 = vld [vmem:[%s1983_s5 + $0x40] sm:$0xff]  ;;  %v526_v25 = vld [vmem:[%s1983_s5 + $0x38] sm:$0xff] }
  0x43   : > { %1427 = vmatpush.msra.mxu2 %v533_v17  ;;  %1428 = vmatpush.msra.mxu3 %v533_v17  ;;  %473 = vst [vmem:[#allocation2 + $0x58] sm:$0xff] %v1661_v18  ;;  %v525_v26 = vld [vmem:[%s1983_s5 + $0x30] sm:$0xff]  ;;  %v524_v27 = vld [vmem:[%s1983_s5 + $0x28] sm:$0xff]  ;;  %v523_v28 = vld [vmem:[%s1983_s5 + $0x20] sm:$0xff] }
  0x44   : > { %474 = vst [vmem:[#allocation2 + $0x18] sm:$0xff] %v1661_v18  ;;  %540 = vmatpush.msra.mxu0 %v533_v17  ;;  %1426 = vmatpush.msra.mxu1 %v533_v17  ;;  %v522_v29 = vld [vmem:[%s1983_s5 + $0x18] sm:$0xff]  ;;  %v521_v30 = vld [vmem:[%s1983_s5 + $0x10] sm:$0xff]  ;;  %v1412_v31 = vld [vmem:[%s1794_s23 + $0x20] sm:$0xff]  }
  0x45   : > { %1430 = vmatpush.msra.mxu2 %v532_v19  ;;  %1431 = vmatpush.msra.mxu3 %v532_v19  ;;  %475 = vst [vmem:[#allocation2 + $0x50] sm:$0xff] %v1661_v18  ;;  %v1414_v32 = vld [vmem:[%s1794_s23 + $0x30] sm:$0xff]   ;;  %v520_v33 = vld [vmem:[%s1983_s5 + $0x8] sm:$0xff]  ;;  %v1338_v34 = vld [vmem:[%s1794_s23] sm:$0xff]   ;;  %v1355_v37 = vunpack.c.l.bf16 %v1412_v31  ;;  %v1356_v41 = vunpack.c.h.bf16 %v1412_v31 }
  0x46   : > { %476 = vst [vmem:[#allocation2 + $0x68] sm:$0xff] %v1661_v18  ;;  %541 = vmatpush.msra.mxu0 %v532_v19  ;;  %1429 = vmatpush.msra.mxu1 %v532_v19  ;;  %v1410_v35 = vld [vmem:[%s1794_s23 + $0x10] sm:$0xff]   ;;  %v519_v36 = vld [vmem:[%s1983_s5] sm:$0xff]  ;;  %v1363_v38 = vunpack.c.l.bf16 %v1414_v32  ;;  %v1339_v39 = vunpack.c.l.bf16 %v1338_v34  ;;  %v1364_v42 = vunpack.c.h.bf16 %v1414_v32  ;;  %v1340_v43 = vunpack.c.h.bf16 %v1338_v34  ;;  %v1413_v45 = vld [vmem:[%s1794_s23 + $0x28] sm:$0xff]  }
  0x47   : > { %477 = vst [vmem:[#allocation2 + $0x8] sm:$0xff] %v1661_v18  ;;  %1433 = vmatpush.msra.mxu2 %v531_v20  ;;  %1434 = vmatpush.msra.mxu3 %v531_v20  ;;  %v1347_v40 = vunpack.c.l.bf16 %v1410_v35  ;;  %v1348_v44 = vunpack.c.h.bf16 %v1410_v35  ;;  %v1415_v46 = vld [vmem:[%s1794_s23 + $0x38] sm:$0xff]   ;;  %v1409_v47 = vld [vmem:[%s1794_s23 + $0x8] sm:$0xff]   ;;  %v1359_v49 = vunpack.c.l.bf16 %v1413_v45  ;;  %v1360_v53 = vunpack.c.h.bf16 %v1413_v45  ;;  %v1601_v57 = vld [vmem:[%s1984_s6] ss:$0 sm:$0xff] }
  0x48   : > { %478 = vst [vmem:[#allocation2 + $0x48] sm:$0xff] %v1661_v18  ;;  %542 = vmatpush.msra.mxu0 %v531_v20  ;;  %1432 = vmatpush.msra.mxu1 %v531_v20  ;;  %v1411_v48 = vld [vmem:[%s1794_s23 + $0x18] sm:$0xff]   ;;  %v1367_v50 = vunpack.c.l.bf16 %v1415_v46  ;;  %v1343_v51 = vunpack.c.l.bf16 %v1409_v47  ;;  %v1368_v54 = vunpack.c.h.bf16 %v1415_v46  ;;  %v1344_v55 = vunpack.c.h.bf16 %v1409_v47 }
  0x49   : > { %479 = vst [vmem:[#allocation2 + $0x40] sm:$0xff] %v1661_v18  ;;  %1436 = vmatpush.msra.mxu2 %v530_v21  ;;  %1437 = vmatpush.msra.mxu3 %v530_v21  ;;  %v1351_v52 = vunpack.c.l.bf16 %v1411_v48  ;;  %v1352_v56 = vunpack.c.h.bf16 %v1411_v48 }
  0x4a   : > { %480 = vst [vmem:[#allocation2 + $0x20] sm:$0xff] %v1661_v18  ;;  %543 = vmatpush.msra.mxu0 %v530_v21  ;;  %1435 = vmatpush.msra.mxu1 %v530_v21 }
  0x4b   : > { %481 = vst [vmem:[#allocation2 + $0x10] sm:$0xff] %v1661_v18  ;;  %1439 = vmatpush.msra.mxu2 %v529_v22  ;;  %1440 = vmatpush.msra.mxu3 %v529_v22 }
  0x4c   : > { %482 = vst [vmem:[#allocation2 + $0x38] sm:$0xff] %v1661_v18  ;;  %544 = vmatpush.msra.mxu0 %v529_v22  ;;  %1438 = vmatpush.msra.mxu1 %v529_v22 }
  0x4d   : > { %483 = vst [vmem:[#allocation2 + $0x60] sm:$0xff] %v1661_v18  ;;  %1442 = vmatpush.msra.mxu2 %v528_v23  ;;  %1443 = vmatpush.msra.mxu3 %v528_v23 }
  0x4e   : > { %484 = vst [vmem:[#allocation2 + $0x70] sm:$0xff] %v1661_v18  ;;  %545 = vmatpush.msra.mxu0 %v528_v23  ;;  %1441 = vmatpush.msra.mxu1 %v528_v23 }
  0x4f   : > { %485 = vst [vmem:[#allocation2 + $0x78] sm:$0xff] %v1661_v18  ;;  %1445 = vmatpush.msra.mxu2 %v527_v24  ;;  %1446 = vmatpush.msra.mxu3 %v527_v24 }
  0x50   : > { %486 = vst [vmem:[#allocation2 + $0x28] sm:$0xff] %v1661_v18  ;;  %546 = vmatpush.msra.mxu0 %v527_v24  ;;  %1444 = vmatpush.msra.mxu1 %v527_v24 }
  0x51   : > { %1448 = vmatpush.msra.mxu2 %v526_v25  ;;  %1449 = vmatpush.msra.mxu3 %v526_v25 }
  0x52   : > { %547 = vmatpush.msra.mxu0 %v526_v25  ;;  %1447 = vmatpush.msra.mxu1 %v526_v25 }
  0x53   : > { %1451 = vmatpush.msra.mxu2 %v525_v26  ;;  %1452 = vmatpush.msra.mxu3 %v525_v26 }
  0x54   : > { %548 = vmatpush.msra.mxu0 %v525_v26  ;;  %1450 = vmatpush.msra.mxu1 %v525_v26 }
  0x55   : > { %1454 = vmatpush.msra.mxu2 %v524_v27  ;;  %1455 = vmatpush.msra.mxu3 %v524_v27 }
  0x56   : > { %549 = vmatpush.msra.mxu0 %v524_v27  ;;  %1453 = vmatpush.msra.mxu1 %v524_v27 }
  0x57   : > { %1457 = vmatpush.msra.mxu2 %v523_v28  ;;  %1458 = vmatpush.msra.mxu3 %v523_v28 }
  0x58   : > { %550 = vmatpush.msra.mxu0 %v523_v28  ;;  %1456 = vmatpush.msra.mxu1 %v523_v28 }
  0x59   : > { %1460 = vmatpush.msra.mxu2 %v522_v29  ;;  %1461 = vmatpush.msra.mxu3 %v522_v29 }
  0x5a   : > { %551 = vmatpush.msra.mxu0 %v522_v29  ;;  %1459 = vmatpush.msra.mxu1 %v522_v29 }
  0x5b   : > { %1463 = vmatpush.msra.mxu2 %v521_v30  ;;  %1464 = vmatpush.msra.mxu3 %v521_v30 }
  0x5c   : > { %552 = vmatpush.msra.mxu0 %v521_v30  ;;  %1462 = vmatpush.msra.mxu1 %v521_v30 }
  0x5d   : > { %1466 = vmatpush.msra.mxu2 %v520_v33  ;;  %1467 = vmatpush.msra.mxu3 %v520_v33 }
  0x5e   : > { %553 = vmatpush.msra.mxu0 %v520_v33  ;;  %1465 = vmatpush.msra.mxu1 %v520_v33 }
  0x5f   : > { %1469 = vmatpush.msra.mxu2 %v519_v36  ;;  %1470 = vmatpush.msra.mxu3 %v519_v36 }
  0x60   : > { %579 = vmatmul.f32.vlgmr.msra.gmra.mxu2 %v1355_v37  ;;  %591 = vmatmul.f32.vlgmr.msra.gmra.mxu3 %v1363_v38 }
  0x61   : > { %554 = vmatpush.msra.mxu0 %v519_v36  ;;  %1468 = vmatpush.msra.mxu1 %v519_v36 }
  0x62   : > { %555 = vmatmul.f32.vlgmr.msra.gmra.mxu0 %v1339_v39  ;;  %567 = vmatmul.f32.vlgmr.msra.gmra.mxu1 %v1347_v40 }
  0x68   : > { %582 = vmatmul.f32.gmra.mxu2 %v1356_v41  ;;  %594 = vmatmul.f32.gmra.mxu3 %v1364_v42 }
  0x6a   : > { %558 = vmatmul.f32.gmra.mxu0 %v1340_v43  ;;  %570 = vmatmul.f32.gmra.mxu1 %v1348_v44 }
  0x70   : > { %585 = vmatmul.f32.gmra.mxu2 %v1359_v49  ;;  %597 = vmatmul.f32.gmra.mxu3 %v1367_v50 }
  0x72   : > { %561 = vmatmul.f32.gmra.mxu0 %v1343_v51  ;;  %573 = vmatmul.f32.gmra.mxu1 %v1351_v52 }
  0x78   : > { %588 = vmatmul.f32.gmra.mxu2 %v1360_v53  ;;  %600 = vmatmul.f32.gmra.mxu3 %v1368_v54 }
  0x7a   : > { %564 = vmatmul.f32.gmra.mxu0 %v1344_v55  ;;  %576 = vmatmul.f32.gmra.mxu1 %v1352_v56 }
  0xdf   : > { %v556_v58 = vpop.f32.mrf.mxu0  ;;  %v568_v59 = vpop.f32.mrf.mxu1 }
  0xe0   : > { %v557_v60 = vadd.f32 %v1601_v57, %v556_v58  ;;  %v569_v61 = vadd.f32 %v1601_v57, %v568_v59 }
  0xe2   : > { %604 = vst [vmem:[#allocation3 + $0x28] sm:$0xff] %v557_v60 }
  0xe3   : > { %608 = vst [vmem:[#allocation3 + $0x48] sm:$0xff] %v569_v61  ;;  %v580_v62 = vpop.f32.mrf.mxu2  ;;  %v592_v63 = vpop.f32.mrf.mxu3 }
  0xe4   : > { %v581_v0 = vadd.f32 %v1601_v57, %v580_v62  ;;  %v593_v1 = vadd.f32 %v1601_v57, %v592_v63 }
  0xe6   : > { %612 = vst [vmem:[#allocation3 + $0x20] sm:$0xff] %v581_v0 }
  0xe7   : > { %616 = vst [vmem:[#allocation3] sm:$0xff] %v593_v1  ;;  %v559_v2 = vpop.f32.mrf.mxu0  ;;  %v571_v3 = vpop.f32.mrf.mxu1 }
  0xe8   : > { %v560_v4 = vadd.f32 %v1601_v57, %v559_v2  ;;  %v572_v5 = vadd.f32 %v1601_v57, %v571_v3 }
  0xea   : > { %605 = vst [vmem:[#allocation3 + $0x68] sm:$0xff] %v560_v4 }
  0xeb   : > { %609 = vst [vmem:[#allocation3 + $0x30] sm:$0xff] %v572_v5  ;;  %v583_v6 = vpop.f32.mrf.mxu2  ;;  %v595_v7 = vpop.f32.mrf.mxu3 }
  0xec   : > { %v584_v8 = vadd.f32 %v1601_v57, %v583_v6  ;;  %v596_v9 = vadd.f32 %v1601_v57, %v595_v7 }
  0xee   : > { %613 = vst [vmem:[#allocation3 + $0x78] sm:$0xff] %v584_v8 }
  0xef   : > { %617 = vst [vmem:[#allocation3 + $0x8] sm:$0xff] %v596_v9  ;;  %v562_v10 = vpop.f32.mrf.mxu0  ;;  %v574_v11 = vpop.f32.mrf.mxu1 }
  0xf0   : > { %v563_v12 = vadd.f32 %v1601_v57, %v562_v10  ;;  %v575_v13 = vadd.f32 %v1601_v57, %v574_v11 }
  0xf2   : > { %606 = vst [vmem:[#allocation3 + $0x10] sm:$0xff] %v563_v12 }
  0xf3   : > { %610 = vst [vmem:[#allocation3 + $0x70] sm:$0xff] %v575_v13  ;;  %v586_v14 = vpop.f32.mrf.mxu2  ;;  %v598_v15 = vpop.f32.mrf.mxu3 }
  0xf4   : > { %v587_v16 = vadd.f32 %v1601_v57, %v586_v14  ;;  %v599_v17 = vadd.f32 %v1601_v57, %v598_v15 }
  0xf6   : > { %614 = vst [vmem:[#allocation3 + $0x18] sm:$0xff] %v587_v16 }
  0xf7   : > { %618 = vst [vmem:[#allocation3 + $0x60] sm:$0xff] %v599_v17  ;;  %v565_v18 = vpop.f32.mrf.mxu0  ;;  %v577_v19 = vpop.f32.mrf.mxu1 }
  0xf8   : > { %v566_v20 = vadd.f32 %v1601_v57, %v565_v18  ;;  %v578_v21 = vadd.f32 %v1601_v57, %v577_v19 }
  0xfa   : > { %607 = vst [vmem:[#allocation3 + $0x40] sm:$0xff] %v566_v20 }
  0xfb   : > { %611 = vst [vmem:[#allocation3 + $0x38] sm:$0xff] %v578_v21  ;;  %v589_v22 = vpop.f32.mrf.mxu2  ;;  %v601_v23 = vpop.f32.mrf.mxu3 }
  0xfc   : > { %v590_v24 = vadd.f32 %v1601_v57, %v589_v22  ;;  %v602_v25 = vadd.f32 %v1601_v57, %v601_v23 }
  0xfe   : > { %615 = vst [vmem:[#allocation3 + $0x58] sm:$0xff] %v590_v24 }
  0xff   : > { %619 = vst [vmem:[#allocation3 + $0x50] sm:$0xff] %v602_v25 }
 0x100 PF: > { %v1336_v26 = vld [vmem:[%s1789_s18 + $0x38] sm:$0xff]  ;;  %v1335_v27 = vld [vmem:[%s1789_s18 + $0x30] sm:$0xff]  ;;  %v1334_v28 = vld [vmem:[%s1789_s18 + $0x28] sm:$0xff]  ;;  %p1317_p13 = scmp.ne.s32.totalorder %s1643_s26, 1 }
 0x101   : > { %764 = vmatpush.bf16.msra.mxu0 %v1336_v26  ;;  %1471 = vmatpush.bf16.msra.mxu1 %v1336_v26  ;;  %v1333_v29 = vld [vmem:[%s1789_s18 + $0x20] sm:$0xff]  ;;  %v1332_v30 = vld [vmem:[%s1789_s18 + $0x18] sm:$0xff]  ;;  %v1331_v31 = vld [vmem:[%s1789_s18 + $0x10] sm:$0xff] }
 0x102   : > { %1472 = vmatpush.bf16.msra.mxu2 %v1336_v26  ;;  %1473 = vmatpush.bf16.msra.mxu3 %v1336_v26  ;;  %v1330_v32 = vld [vmem:[%s1789_s18 + $0x8] sm:$0xff]  ;;  %v1329_v33 = vld [vmem:[%s1789_s18] sm:$0xff]  ;;  %v1323_v35 = vld [vmem:[%s1806_s15 + $0x10] sm:$0xff] }
 0x103   : > { %v1321_v34 = vld [vmem:[%s1806_s15] sm:$0xff]  ;;  %v1327_v37 = vld [vmem:[%s1806_s15 + $0x30] sm:$0xff]  ;;  %v1322_v38 = vld [vmem:[%s1806_s15 + $0x8] sm:$0xff] }
 0x104   : > { %v1325_v36 = vld [vmem:[%s1806_s15 + $0x20] sm:$0xff]  ;;  %v1324_v39 = vld [vmem:[%s1806_s15 + $0x18] sm:$0xff]  ;;  %v1326_v40 = vld [vmem:[%s1806_s15 + $0x28] sm:$0xff] }
 0x105   : > { %765 = vmatpush.bf16.msra.mxu0 %v1335_v27  ;;  %1474 = vmatpush.bf16.msra.mxu1 %v1335_v27  ;;  %v1328_v41 = vld [vmem:[%s1806_s15 + $0x38] sm:$0xff]  ;;  %v620_v42 = vld [vmem:[#allocation2 + $0x30] sm:$0xff]  ;;  %v628_v48 = vld [vmem:[#allocation2 + $0x40] sm:$0xff] }
 0x106   : > { %1475 = vmatpush.bf16.msra.mxu2 %v1335_v27  ;;  %1476 = vmatpush.bf16.msra.mxu3 %v1335_v27  ;;  %v624_v43 = vld [vmem:[#allocation2 + $0x50] sm:$0xff]  ;;  %v632_v49 = vld [vmem:[#allocation2 + $0x60] sm:$0xff]  ;;  %v625_v51 = vld [vmem:[#allocation2 + $0x68] sm:$0xff] }
 0x107   : > { %v621_v50 = vld [vmem:[#allocation2] sm:$0xff]  ;;  %v633_v61 = vld [vmem:[#allocation2 + $0x70] sm:$0xff]  ;;  %v622_v62 = vld [vmem:[#allocation2 + $0x58] sm:$0xff] }
 0x108   : > { %v629_v60 = vld [vmem:[#allocation2 + $0x20] sm:$0xff]  ;;  %v626_v63 = vld [vmem:[#allocation2 + $0x8] sm:$0xff]  ;;  %v630_v8 = vld [vmem:[#allocation2 + $0x10] sm:$0xff] }
 0x109   : > { %766 = vmatpush.bf16.msra.mxu0 %v1334_v28  ;;  %1477 = vmatpush.bf16.msra.mxu1 %v1334_v28  ;;  %v634_v9 = vld [vmem:[#allocation2 + $0x78] sm:$0xff]  ;;  %v627_v11 = vld [vmem:[#allocation2 + $0x48] sm:$0xff] }
 0x10a   : > { %1478 = vmatpush.bf16.msra.mxu2 %v1334_v28  ;;  %1479 = vmatpush.bf16.msra.mxu3 %v1334_v28  ;;  %v623_v10 = vld [vmem:[#allocation2 + $0x18] sm:$0xff]  ;;  %v635_v21 = vld [vmem:[#allocation2 + $0x28] sm:$0xff] }
 0x10b   : > { %v631_v20 = vld [vmem:[#allocation2 + $0x38] sm:$0xff] }
 0x10d   : > { %767 = vmatpush.bf16.msra.mxu0 %v1333_v29  ;;  %1480 = vmatpush.bf16.msra.mxu1 %v1333_v29 }
 0x10e   : > { %1481 = vmatpush.bf16.msra.mxu2 %v1333_v29  ;;  %1482 = vmatpush.bf16.msra.mxu3 %v1333_v29 }
 0x111   : > { %768 = vmatpush.bf16.msra.mxu0 %v1332_v30  ;;  %1483 = vmatpush.bf16.msra.mxu1 %v1332_v30 }
 0x112   : > { %1484 = vmatpush.bf16.msra.mxu2 %v1332_v30  ;;  %1485 = vmatpush.bf16.msra.mxu3 %v1332_v30 }
 0x115   : > { %769 = vmatpush.bf16.msra.mxu0 %v1331_v31  ;;  %1486 = vmatpush.bf16.msra.mxu1 %v1331_v31 }
 0x116   : > { %1487 = vmatpush.bf16.msra.mxu2 %v1331_v31  ;;  %1488 = vmatpush.bf16.msra.mxu3 %v1331_v31 }
 0x119   : > { %770 = vmatpush.bf16.msra.mxu0 %v1330_v32  ;;  %1489 = vmatpush.bf16.msra.mxu1 %v1330_v32 }
 0x11a   : > { %1490 = vmatpush.bf16.msra.mxu2 %v1330_v32  ;;  %1491 = vmatpush.bf16.msra.mxu3 %v1330_v32 }
 0x11d   : > { %771 = vmatpush.bf16.msra.mxu0 %v1329_v33  ;;  %1492 = vmatpush.bf16.msra.mxu1 %v1329_v33 }
 0x11e   : > { %1493 = vmatpush.bf16.msra.mxu2 %v1329_v33  ;;  %1494 = vmatpush.bf16.msra.mxu3 %v1329_v33 }
 0x120   : > { %772 = vmatmul.bf16.vlgmr.msra.gmra.mxu0 %v1321_v34  ;;  %782 = vmatmul.bf16.vlgmr.msra.gmra.mxu1 %v1323_v35 }
 0x121   : > { %792 = vmatmul.bf16.vlgmr.msra.gmra.mxu2 %v1325_v36  ;;  %802 = vmatmul.bf16.vlgmr.msra.gmra.mxu3 %v1327_v37 }
 0x130   : > { %777 = vmatmul.bf16.gmra.mxu0 %v1322_v38  ;;  %787 = vmatmul.bf16.gmra.mxu1 %v1324_v39 }
 0x131   : > { %797 = vmatmul.bf16.gmra.mxu2 %v1326_v40  ;;  %807 = vmatmul.bf16.gmra.mxu3 %v1328_v41 }
 0x19d   : > { %v773_v44 = vpop.f32.mrf.mxu0  ;;  %v783_v45 = vpop.f32.mrf.mxu1 }
 0x19e   : > { %v813_v46 = vadd.f32 %v773_v44, %v620_v42  ;;  %v817_v47 = vadd.f32 %v783_v45, %v624_v43 }
 0x1a0   : > { %829 = vst [vmem:[#allocation2 + $0x30] sm:$0xff] %v813_v46 }
 0x1a1   : > { %833 = vst [vmem:[#allocation2 + $0x50] sm:$0xff] %v817_v47 }
 0x1a4   : > { %v793_v52 = vpop.f32.mrf.mxu2  ;;  %v803_v53 = vpop.f32.mrf.mxu3 }
 0x1a5   : > { %v821_v54 = vadd.f32 %v793_v52, %v628_v48  ;;  %v825_v55 = vadd.f32 %v803_v53, %v632_v49  ;;  %v775_v56 = vpop.f32.mrf.mxu0  ;;  %v785_v57 = vpop.f32.mrf.mxu1 }
 0x1a6   : > { %v814_v58 = vadd.f32 %v775_v56, %v621_v50  ;;  %v818_v59 = vadd.f32 %v785_v57, %v625_v51 }
 0x1a7   : > { %837 = vst [vmem:[#allocation2 + $0x40] sm:$0xff] %v821_v54 }
 0x1a8   : > { %841 = vst [vmem:[#allocation2 + $0x60] sm:$0xff] %v825_v55 }
 0x1a9   : > { %830 = vst [vmem:[#allocation2] sm:$0xff] %v814_v58 }
 0x1aa   : > { %834 = vst [vmem:[#allocation2 + $0x68] sm:$0xff] %v818_v59 }
 0x1ac   : > { %v795_v0 = vpop.f32.mrf.mxu2  ;;  %v805_v1 = vpop.f32.mrf.mxu3 }
 0x1ad   : > { %v822_v2 = vadd.f32 %v795_v0, %v629_v60  ;;  %v826_v3 = vadd.f32 %v805_v1, %v633_v61  ;;  %v778_v4 = vpop.f32.mrf.mxu0  ;;  %v788_v5 = vpop.f32.mrf.mxu1 }
 0x1ae   : > { %v815_v6 = vadd.f32 %v778_v4, %v622_v62  ;;  %v819_v7 = vadd.f32 %v788_v5, %v626_v63 }
 0x1af   : > { %838 = vst [vmem:[#allocation2 + $0x20] sm:$0xff] %v822_v2 }
 0x1b0   : > { %842 = vst [vmem:[#allocation2 + $0x70] sm:$0xff] %v826_v3 }
 0x1b1   : > { %831 = vst [vmem:[#allocation2 + $0x58] sm:$0xff] %v815_v6 }
 0x1b2   : > { %835 = vst [vmem:[#allocation2 + $0x8] sm:$0xff] %v819_v7 }
 0x1b4   : > { %v798_v12 = vpop.f32.mrf.mxu2  ;;  %v808_v13 = vpop.f32.mrf.mxu3 }
 0x1b5   : > { %v823_v14 = vadd.f32 %v798_v12, %v630_v8  ;;  %v827_v15 = vadd.f32 %v808_v13, %v634_v9  ;;  %v780_v16 = vpop.f32.mrf.mxu0  ;;  %v790_v17 = vpop.f32.mrf.mxu1 }
 0x1b6   : > { %v816_v18 = vadd.f32 %v780_v16, %v623_v10  ;;  %v820_v19 = vadd.f32 %v790_v17, %v627_v11 }
 0x1b7   : > { %839 = vst [vmem:[#allocation2 + $0x10] sm:$0xff] %v823_v14 }
 0x1b8   : > { %843 = vst [vmem:[#allocation2 + $0x78] sm:$0xff] %v827_v15 }
 0x1b9   : > { %832 = vst [vmem:[#allocation2 + $0x18] sm:$0xff] %v816_v18 }
 0x1ba   : > { %836 = vst [vmem:[#allocation2 + $0x48] sm:$0xff] %v820_v19 }
 0x1bc   : > { %v800_v22 = vpop.f32.mrf.mxu2  ;;  %v810_v23 = vpop.f32.mrf.mxu3  ;;  %848 = sbr.rel (%p1317_p13) target bundleno = 742 (0x2e6), region = 97 }
 0x1bd   : > { %v824_v24 = vadd.f32 %v800_v22, %v631_v20  ;;  %v828_v25 = vadd.f32 %v810_v23, %v635_v21 }
 0x1bf   : > { %840 = vst [vmem:[#allocation2 + $0x38] sm:$0xff] %v824_v24 }
 0x1c0   : > { %844 = vst [vmem:[#allocation2 + $0x28] sm:$0xff] %v828_v25 }
 0x1c1   : > { %v874_v26 = vld [vmem:[%s1799_s27 + $0x48] sm:$0xff]  ;;  %v873_v27 = vld [vmem:[%s1799_s27 + $0x40] sm:$0xff]  ;;  %v1662_v29 = vmov 0   ;;  %v992_v33 = vld [vmem:[%s1982_s4 + $0x78] sm:$0xff] }
 0x1c2   : > { %v865_v28 = vld [vmem:[%s1799_s27] sm:$0xff]  ;;  %1604 = vset.pattern.permute.xlu2 %v1662_v29  ;;  %1603 = vset.pattern.permute.xlu1 %v1662_v29  ;;  %v878_v30 = vld [vmem:[%s1799_s27 + $0x68] sm:$0xff]  ;;  %v991_v34 = vld [vmem:[%s1982_s4 + $0x70] sm:$0xff] }
 0x1c3   : > { %1602 = vset.pattern.permute.xlu0 %v1662_v29  ;;  %928 = vperm.xlu2 %1604, %v874_v26   ;;  %v877_v31 = vld [vmem:[%s1799_s27 + $0x60] sm:$0xff]  ;;  %v990_v35 = vld [vmem:[%s1982_s4 + $0x68] sm:$0xff]  ;;  %v875_v36 = vld [vmem:[%s1799_s27 + $0x50] sm:$0xff] }
 0x1c4   : > { %923 = vperm.xlu0 %1602, %v873_v27   ;;  %883 = vperm.xlu1 %1603, %v865_v28   ;;  %v869_v32 = vld [vmem:[%s1799_s27 + $0x20] sm:$0xff]  ;;  %v866_v37 = vld [vmem:[%s1799_s27 + $0x8] sm:$0xff]  ;;  %v871_v39 = vld [vmem:[%s1799_s27 + $0x30] sm:$0xff] }
 0x1c5   : > { %1496 = vmatpush.msra.mxu2 %v992_v33  ;;  %1009 = vmatpush.msra.mxu0 %v992_v33  ;;  %v870_v38 = vld [vmem:[%s1799_s27 + $0x28] sm:$0xff]  ;;  %v879_v40 = vld [vmem:[%s1799_s27 + $0x70] sm:$0xff]  ;;  %v868_v42 = vld [vmem:[%s1799_s27 + $0x18] sm:$0xff] }
 0x1c6   : > { %1495 = vmatpush.msra.mxu1 %v992_v33  ;;  %1497 = vmatpush.msra.mxu3 %v992_v33  ;;  %v867_v41 = vld [vmem:[%s1799_s27 + $0x10] sm:$0xff]  ;;  %v876_v43 = vld [vmem:[%s1799_s27 + $0x58] sm:$0xff]  ;;  %v989_v46 = vld [vmem:[%s1982_s4 + $0x60] sm:$0xff] }
 0x1c7   : > { %1499 = vmatpush.msra.mxu2 %v991_v34  ;;  %1010 = vmatpush.msra.mxu0 %v991_v34  ;;  %v880_v44 = vld [vmem:[%s1799_s27 + $0x78] sm:$0xff]  ;;  %v987_v48 = vld [vmem:[%s1982_s4 + $0x50] sm:$0xff]  ;;  %v986_v49 = vld [vmem:[%s1982_s4 + $0x48] sm:$0xff] }
 0x1c8   : > { %1498 = vmatpush.msra.mxu1 %v991_v34  ;;  %1500 = vmatpush.msra.mxu3 %v991_v34  ;;  %v872_v45 = vld [vmem:[%s1799_s27 + $0x38] sm:$0xff]  ;;  %v985_v50 = vld [vmem:[%s1982_s4 + $0x40] sm:$0xff]  ;;  %v983_v52 = vld [vmem:[%s1982_s4 + $0x30] sm:$0xff] }
 0x1c9   : > { %1502 = vmatpush.msra.mxu2 %v990_v35  ;;  %1011 = vmatpush.msra.mxu0 %v990_v35  ;;  %v988_v47 = vld [vmem:[%s1982_s4 + $0x58] sm:$0xff]  ;;  %v982_v53 = vld [vmem:[%s1982_s4 + $0x28] sm:$0xff]  ;;  %v981_v54 = vld [vmem:[%s1982_s4 + $0x20] sm:$0xff] }
 0x1ca   : > { %1501 = vmatpush.msra.mxu1 %v990_v35  ;;  %1503 = vmatpush.msra.mxu3 %v990_v35  ;;  %v984_v51 = vld [vmem:[%s1982_s4 + $0x38] sm:$0xff]  ;;  %v979_v56 = vld [vmem:[%s1982_s4 + $0x10] sm:$0xff]  ;;  %v978_v57 = vld [vmem:[%s1982_s4 + $0x8] sm:$0xff] }
 0x1cb   : > { %948 = vperm.xlu2 %1604, %v878_v30   ;;  %1505 = vmatpush.msra.mxu2 %v989_v46  ;;  %v980_v55 = vld [vmem:[%s1982_s4 + $0x18] sm:$0xff]  ;;  %v977_v58 = vld [vmem:[%s1982_s4] sm:$0xff]  ;;  %v849_v61 = vld [vmem:[#allocation2 + $0x30] sm:$0xff] }
 0x1cc   : > { %943 = vperm.xlu0 %1602, %v877_v31   ;;  %903 = vperm.xlu1 %1603, %v869_v32   ;;  %v857_v60 = vld [vmem:[#allocation2 + $0x40] sm:$0xff]  ;;  %v853_v5 = vld [vmem:[#allocation2 + $0x50] sm:$0xff]  ;;  %v854_v13 = vld [vmem:[#allocation2 + $0x68] sm:$0xff] }
 0x1cd   : > { %1012 = vmatpush.msra.mxu0 %v989_v46  ;;  %1504 = vmatpush.msra.mxu1 %v989_v46  ;;  %v858_v3 = vld [vmem:[#allocation2 + $0x20] sm:$0xff]  ;;  %v862_v14 = vld [vmem:[#allocation2 + $0x70] sm:$0xff]  ;;  %v855_v23 = vld [vmem:[#allocation2 + $0x8] sm:$0xff] }
 0x1ce   : > { %1506 = vmatpush.msra.mxu3 %v989_v46  ;;  %1508 = vmatpush.msra.mxu2 %v988_v47  ;;  %v861_v4 = vld [vmem:[#allocation2 + $0x60] sm:$0xff]  ;;  %v859_v15 = vld [vmem:[#allocation2 + $0x10] sm:$0xff]  ;;  %v863_v24 = vld [vmem:[#allocation2 + $0x78] sm:$0xff] }
 0x1cf   : > { %1013 = vmatpush.msra.mxu0 %v988_v47  ;;  %1507 = vmatpush.msra.mxu1 %v988_v47  ;;  %v850_v12 = vld [vmem:[#allocation2] sm:$0xff]  ;;  %v851_v25 = vld [vmem:[#allocation2 + $0x58] sm:$0xff]  ;;  %v864_v34 = vld [vmem:[#allocation2 + $0x28] sm:$0xff] }
 0x1d0   : > { %1509 = vmatpush.msra.mxu3 %v988_v47  ;;  %1511 = vmatpush.msra.mxu2 %v987_v48  ;;  %v852_v32 = vld [vmem:[#allocation2 + $0x18] sm:$0xff]  ;;  %v1001_v46 = vld [vmem:[#allocation3 + $0x20] sm:$0xff]  ;;  %v993_v47 = vld [vmem:[#allocation3 + $0x28] sm:$0xff] }
 0x1d1   : > { %1014 = vmatpush.msra.mxu0 %v987_v48  ;;  %1510 = vmatpush.msra.mxu1 %v987_v48  ;;  %v860_v33 = vld [vmem:[#allocation2 + $0x38] sm:$0xff] }
 0x1d2   : > { %1512 = vmatpush.msra.mxu3 %v987_v48  ;;  %1514 = vmatpush.msra.mxu2 %v986_v49  ;;  %v997_v48 = vld [vmem:[#allocation3 + $0x48] sm:$0xff] }
 0x1d3   : > { %933 = vperm.xlu2 %1604, %v875_v36   ;;  %1015 = vmatpush.msra.mxu0 %v986_v49 }
 0x1d4   : > { %888 = vperm.xlu0 %1602, %v866_v37   ;;  %908 = vperm.xlu1 %1603, %v870_v38  }
 0x1d5   : > { %1513 = vmatpush.msra.mxu1 %v986_v49  ;;  %1515 = vmatpush.msra.mxu3 %v986_v49  ;;  %v1002_v49 = vld [vmem:[#allocation3 + $0x78] sm:$0xff] }
 0x1d6   : > { %1517 = vmatpush.msra.mxu2 %v985_v50  ;;  %1016 = vmatpush.msra.mxu0 %v985_v50 }
 0x1d7   : > { %1516 = vmatpush.msra.mxu1 %v985_v50  ;;  %1518 = vmatpush.msra.mxu3 %v985_v50 }
 0x1d8   : > { %1520 = vmatpush.msra.mxu2 %v984_v51  ;;  %1017 = vmatpush.msra.mxu0 %v984_v51 }
 0x1d9   : > { %1519 = vmatpush.msra.mxu1 %v984_v51  ;;  %1521 = vmatpush.msra.mxu3 %v984_v51 }
 0x1da   : > { %1523 = vmatpush.msra.mxu2 %v983_v52  ;;  %1018 = vmatpush.msra.mxu0 %v983_v52 }
 0x1db   : > { %913 = vperm.xlu2 %1604, %v871_v39   ;;  %1522 = vmatpush.msra.mxu1 %v983_v52 }
 0x1dc   : > { %953 = vperm.xlu0 %1602, %v879_v40   ;;  %893 = vperm.xlu1 %1603, %v867_v41   ;;  %v856_v40 = vld [vmem:[#allocation2 + $0x48] sm:$0xff] }
 0x1dd   : > { %1524 = vmatpush.msra.mxu3 %v983_v52  ;;  %1526 = vmatpush.msra.mxu2 %v982_v53 }
 0x1de   : > { %1019 = vmatpush.msra.mxu0 %v982_v53  ;;  %1525 = vmatpush.msra.mxu1 %v982_v53 }
 0x1df   : > { %1527 = vmatpush.msra.mxu3 %v982_v53  ;;  %1529 = vmatpush.msra.mxu2 %v981_v54  ;;  %v994_v53 = vld [vmem:[#allocation3 + $0x68] sm:$0xff] }
 0x1e0   : > { %1020 = vmatpush.msra.mxu0 %v981_v54  ;;  %1528 = vmatpush.msra.mxu1 %v981_v54 }
 0x1e1   : > { %1530 = vmatpush.msra.mxu3 %v981_v54  ;;  %1532 = vmatpush.msra.mxu2 %v980_v55  ;;  %v998_v54 = vld [vmem:[#allocation3 + $0x30] sm:$0xff] }
 0x1e2   : > { %1021 = vmatpush.msra.mxu0 %v980_v55  ;;  %1531 = vmatpush.msra.mxu1 %v980_v55 }
 0x1e3   : > { %898 = vperm.xlu2 %1604, %v868_v42   ;;  %1533 = vmatpush.msra.mxu3 %v980_v55 }
 0x1e4   : > { %938 = vperm.xlu0 %1602, %v876_v43   ;;  %958 = vperm.xlu1 %1603, %v880_v44  }
 0x1e5   : > { %1535 = vmatpush.msra.mxu2 %v979_v56  ;;  %1022 = vmatpush.msra.mxu0 %v979_v56 }
 0x1e6   : > { %1534 = vmatpush.msra.mxu1 %v979_v56  ;;  %1536 = vmatpush.msra.mxu3 %v979_v56 }
 0x1e7   : > { %1538 = vmatpush.msra.mxu2 %v978_v57  ;;  %1023 = vmatpush.msra.mxu0 %v978_v57 }
 0x1e8   : > { %1537 = vmatpush.msra.mxu1 %v978_v57  ;;  %1539 = vmatpush.msra.mxu3 %v978_v57 }
 0x1e9   : > { %1541 = vmatpush.msra.mxu2 %v977_v58  ;;  %1024 = vmatpush.msra.mxu0 %v977_v58 }
 0x1ea   : > { %1540 = vmatpush.msra.mxu1 %v977_v58  ;;  %1542 = vmatpush.msra.mxu3 %v977_v58 }
 0x1ec   : > { %918 = vperm.xlu0 %1602, %v872_v45  }
 0x21d   : > { %v929_v59 = vpop.permute.xlu2 %928 }
 0x21e   : > { %v970_v6 = vmul.f32 %v929_v59, %v858_v3  ;;  %v1005_v3 = vld [vmem:[#allocation3] sm:$0xff] }
 0x225   : > { %v949_v62 = vpop.permute.xlu2 %948 }
 0x226   : > { %v974_v20 = vmul.f32 %v949_v62, %v862_v14 }
 0x22d   : > { %v934_v11 = vpop.permute.xlu2 %933 }
 0x22e   : > { %v971_v21 = vmul.f32 %v934_v11, %v859_v15 }
 0x235   : > { %v914_v22 = vpop.permute.xlu2 %913 }
 0x236   : > { %v924_v63 = vpop.permute.xlu0 %923  ;;  %v884_v0 = vpop.permute.xlu1 %883  ;;  %v967_v28 = vmul.f32 %v914_v22, %v855_v23 }
 0x237   : > { %v969_v1 = vmul.f32 %v924_v63, %v857_v60  ;;  %v961_v2 = vmul.f32 %v884_v0, %v849_v61 }
 0x239   : > { %1049 = vmatmul.f32.vlgmr.msra.gmra.mxu2 %v969_v1  ;;  %1025 = vmatmul.f32.vlgmr.msra.gmra.mxu0 %v961_v2 }
 0x23d   : > { %v899_v31 = vpop.permute.xlu2 %898 }
 0x23e   : > { %v944_v7 = vpop.permute.xlu0 %943  ;;  %v904_v8 = vpop.permute.xlu1 %903  ;;  %v964_v37 = vmul.f32 %v899_v31, %v852_v32  ;;  %v1008_v32 = vld [vmem:[#allocation3 + $0x50] sm:$0xff] }
 0x23f   : > { %v973_v9 = vmul.f32 %v944_v7, %v861_v4  ;;  %v965_v10 = vmul.f32 %v904_v8, %v853_v5  ;;  %v1006_v8 = vld [vmem:[#allocation3 + $0x8] sm:$0xff] }
 0x241   : > { %1037 = vmatmul.f32.vlgmr.msra.gmra.mxu1 %v965_v10  ;;  %1052 = vmatmul.f32.gmra.mxu2 %v970_v6 }
 0x242   : > { %1061 = vmatmul.f32.vlgmr.msra.gmra.mxu3 %v973_v9 }
 0x246   : > { %v889_v16 = vpop.permute.xlu0 %888  ;;  %v909_v17 = vpop.permute.xlu1 %908 }
 0x247   : > { %v962_v18 = vmul.f32 %v889_v16, %v850_v12  ;;  %v966_v19 = vmul.f32 %v909_v17, %v854_v13  ;;  %v995_v16 = vld [vmem:[#allocation3 + $0x10] sm:$0xff] }
 0x249   : > { %1028 = vmatmul.f32.gmra.mxu0 %v962_v18  ;;  %1040 = vmatmul.f32.gmra.mxu1 %v966_v19  ;;  %v996_v18 = vld [vmem:[#allocation3 + $0x40] sm:$0xff] }
 0x24a   : > { %1055 = vmatmul.f32.gmra.mxu2 %v971_v21  ;;  %1064 = vmatmul.f32.gmra.mxu3 %v974_v20 }
 0x24e   : > { %v954_v26 = vpop.permute.xlu0 %953  ;;  %v894_v27 = vpop.permute.xlu1 %893 }
 0x24f   : > { %v975_v29 = vmul.f32 %v954_v26, %v863_v24  ;;  %v963_v30 = vmul.f32 %v894_v27, %v851_v25  ;;  %v1003_v24 = vld [vmem:[#allocation3 + $0x18] sm:$0xff]  ;;  %v1007_v26 = vld [vmem:[#allocation3 + $0x60] sm:$0xff] }
 0x251   : > { %1031 = vmatmul.f32.gmra.mxu0 %v963_v30  ;;  %1043 = vmatmul.f32.gmra.mxu1 %v967_v28  ;;  %v999_v28 = vld [vmem:[#allocation3 + $0x70] sm:$0xff] }
 0x252   : > { %1067 = vmatmul.f32.gmra.mxu3 %v975_v29  ;;  %v1004_v29 = vld [vmem:[#allocation3 + $0x58] sm:$0xff] }
 0x256   : > { %v939_v35 = vpop.permute.xlu0 %938  ;;  %v959_v36 = vpop.permute.xlu1 %958 }
 0x257   : > { %v972_v38 = vmul.f32 %v939_v35, %v860_v33  ;;  %v976_v39 = vmul.f32 %v959_v36, %v864_v34  ;;  %v1000_v35 = vld [vmem:[#allocation3 + $0x38] sm:$0xff] }
 0x259   : > { %1034 = vmatmul.f32.gmra.mxu0 %v964_v37  ;;  %1058 = vmatmul.f32.gmra.mxu2 %v972_v38 }
 0x25a   : > { %1070 = vmatmul.f32.gmra.mxu3 %v976_v39 }
 0x25e   : > { %v919_v41 = vpop.permute.xlu0 %918 }
 0x25f   : > { %v968_v42 = vmul.f32 %v919_v41, %v856_v40 }
 0x261   : > { %1046 = vmatmul.f32.gmra.mxu1 %v968_v42 }
 0x2b6   : > { %v1026_v44 = vpop.f32.mrf.mxu0 }
 0x2b7   : > { %v1027_v51 = vadd.f32 %v1026_v44, %v993_v47 }
 0x2b9   : > { %v1074_v0 = vmax.f32 %v1027_v51, 0.0 }
 0x2bc   : > { %v1050_v43 = vpop.f32.mrf.mxu2 }
 0x2bd   : > { %v1051_v50 = vadd.f32 %v1050_v43, %v1001_v46 }
 0x2be   : > { %v1038_v45 = vpop.f32.mrf.mxu1 }
 0x2bf   : > { %v1039_v55 = vadd.f32 %v1038_v45, %v997_v48  ;;  %v1082_v60 = vmax.f32 %v1051_v50, 0.0 }
 0x2c1   : > { %v1078_v1 = vmax.f32 %v1039_v55, 0.0 }
 0x2c4   : > { %v1053_v52 = vpop.f32.mrf.mxu2 }
 0x2c5   : > { %v1054_v56 = vadd.f32 %v1053_v52, %v1002_v49  ;;  %v1062_v57 = vpop.f32.mrf.mxu3 }
 0x2c6   : > { %v1029_v58 = vpop.f32.mrf.mxu0  ;;  %v1041_v59 = vpop.f32.mrf.mxu1  ;;  %v1063_v9 = vadd.f32 %v1062_v57, %v1005_v3 }
 0x2c7   : > { %v1083_v61 = vmax.f32 %v1054_v56, 0.0  ;;  %v1030_v62 = vadd.f32 %v1029_v58, %v994_v53  ;;  %v1042_v63 = vadd.f32 %v1041_v59, %v998_v54 }
 0x2c8   : > { %v1086_v13 = vmax.f32 %v1063_v9, 0.0 }
 0x2c9   : > { %v1392_v2 = vpack.c.bf16 %v1083_v61, %v1082_v60  ;;  %v1075_v4 = vmax.f32 %v1030_v62, 0.0  ;;  %v1079_v5 = vmax.f32 %v1042_v63, 0.0 }
 0x2cb   : > { %1419 = vst [vmem:[%s1804_s9 + $0x20] sm:$0xff] %v1392_v2   ;;  %v1372_v6 = vpack.c.bf16 %v1075_v4, %v1074_v0  ;;  %v1382_v7 = vpack.c.bf16 %v1079_v5, %v1078_v1 }
 0x2cd   : > { %1373 = vst [vmem:[%s1804_s9] sm:$0xff] %v1372_v6   ;;  %v1065_v10 = vpop.f32.mrf.mxu3  ;;  %v1056_v17 = vpop.f32.mrf.mxu2 }
 0x2ce   : > { %1417 = vst [vmem:[%s1804_s9 + $0x10] sm:$0xff] %v1382_v7   ;;  %v1066_v11 = vadd.f32 %v1065_v10, %v1006_v8  ;;  %v1032_v12 = vpop.f32.mrf.mxu0  ;;  %v1044_v21 = vpop.f32.mrf.mxu1  ;;  %v1057_v30 = vadd.f32 %v1056_v17, %v1003_v24 }
 0x2cf   : > { %v1033_v19 = vadd.f32 %v1032_v12, %v995_v16  ;;  %v1045_v36 = vadd.f32 %v1044_v21, %v999_v28 }
 0x2d0   : > { %v1087_v14 = vmax.f32 %v1066_v11, 0.0  ;;  %v1084_v41 = vmax.f32 %v1057_v30, 0.0 }
 0x2d1   : > { %v1076_v25 = vmax.f32 %v1033_v19, 0.0  ;;  %v1080_v46 = vmax.f32 %v1045_v36, 0.0 }
 0x2d2   : > { %v1402_v15 = vpack.c.bf16 %v1087_v14, %v1086_v13 }
 0x2d4   : > { %1421 = vst [vmem:[%s1804_s9 + $0x30] sm:$0xff] %v1402_v15  }
 0x2d5   : > { %v1068_v20 = vpop.f32.mrf.mxu3 }
 0x2d6   : > { %v1035_v22 = vpop.f32.mrf.mxu0  ;;  %v1069_v33 = vadd.f32 %v1068_v20, %v1007_v26 }
 0x2d7   : > { %v1036_v23 = vadd.f32 %v1035_v22, %v996_v18 }
 0x2d8   : > { %v1088_v44 = vmax.f32 %v1069_v33, 0.0 }
 0x2d9   : > { %v1077_v27 = vmax.f32 %v1036_v23, 0.0 }
 0x2db   : > { %v1377_v31 = vpack.c.bf16 %v1077_v27, %v1076_v25 }
 0x2dc   : > { %v1059_v34 = vpop.f32.mrf.mxu2 }
 0x2dd   : > { %1416 = vst [vmem:[%s1804_s9 + $0x8] sm:$0xff] %v1377_v31   ;;  %v1060_v37 = vadd.f32 %v1059_v34, %v1004_v29  ;;  %v1071_v38 = vpop.f32.mrf.mxu3 }
 0x2de   : > { %v1072_v39 = vadd.f32 %v1071_v38, %v1008_v32  ;;  %v1047_v40 = vpop.f32.mrf.mxu1 }
 0x2df   : > { %v1085_v42 = vmax.f32 %v1060_v37, 0.0  ;;  %v1048_v43 = vadd.f32 %v1047_v40, %v1000_v35 }
 0x2e0   : > { %v1089_v45 = vmax.f32 %v1072_v39, 0.0 }
 0x2e1   : > { %v1397_v47 = vpack.c.bf16 %v1085_v42, %v1084_v41  ;;  %v1081_v48 = vmax.f32 %v1048_v43, 0.0 }
 0x2e2   : > { %v1407_v49 = vpack.c.bf16 %v1089_v45, %v1088_v44 }
 0x2e3   : > { %1420 = vst [vmem:[%s1804_s9 + $0x28] sm:$0xff] %v1397_v47   ;;  %v1387_v50 = vpack.c.bf16 %v1081_v48, %v1080_v46 }
 0x2e4   : > { %1422 = vst [vmem:[%s1804_s9 + $0x38] sm:$0xff] %v1407_v49  }
 0x2e5   : > { %1418 = vst [vmem:[%s1804_s9 + $0x18] sm:$0xff] %v1387_v50  }
 0x2e6 PF: > { %s17_s30 = sadd.s32 1, %s1659_s30   ;;  %s1990_s22 = sld [smem:[#allocation5_spill]] }
 0x2e7   : > { %p14_p0 = scmp.ge.s32.totalorder %s17_s30, 6   ;;  %s1991_s24 = smov %s1639_s25 }
 0x2e8   : > { %s1992_s25 = smov %s1754_s14  ;;  %s1993_s26 = smov %s1651_s28 }
 0x2e9   : > { %s1994_s27 = smov %s1655_s29  ;;  %s1995_s28 = smov %s1998_s8 }
 0x2ea   :  { %16 = sbr.rel (!%p14_p0) target bundleno = 6 (0x6), region = 141 }
 0x2ec   : > { %s1996_s29 = smov %s1990_s22 }

</bundles_post_ra>
